<compile_context>
chip_gen: v5e
topology: v5e:2x2
jax: 0.10.0
libtpu: 0.0.40
codegen_flags: <defaults>
</compile_context>

<pallas_src>
import jax
import jax.numpy as jnp
from jax.experimental import pallas as pl
from jax.experimental.pallas import tpu as pltpu

EPS = 1e-12  # torch.nn.functional.normalize default eps


def _arcface_head_kernel(x_ref, wt_ref, o_ref, xn_ref):
    """One grid step: normalized batch against one contiguous class tile.

    x_ref:  (B, D)       raw embedding block (resident every step, one DMA)
    wt_ref: (D, TN)      pre-normalized, pre-transposed, contiguous W slab
    o_ref:  (B, TN)      cosine-logit tile
    xn_ref: (B, D) VMEM  scratch holding the normalized embeddings
    """
    # Hoisted x-normalization: runs only at the first step of the sequential
    # inner axis (so at most n_outer times per forward, and exactly once per
    # TensorCore when the parallel axis is sharded on v7x).  Exact sqrt +
    # reciprocal-multiply keeps the 1e-5 tolerance.
    @pl.when(pl.program_id(1) == 0)
    def _():
        x = x_ref[...].astype(jnp.float32)
        norm_sq = jnp.sum(x * x, axis=-1, keepdims=True)
        inv_norm = 1.0 / jnp.maximum(jnp.sqrt(norm_sq), EPS)
        xn_ref[...] = x * inv_norm

    w = wt_ref[...]
    xn = xn_ref[...].astype(w.dtype)
    # RHS is already in MXU-native layout (K on sublanes, N on lanes): no
    # transpose/relayout, and the output lane axis matches out_spec directly.
    # Pin HIGHEST precision for the f32 path (review correctness concern);
    # the bf16 weight path uses the native bf16 MXU pass.
    prec = (jax.lax.Precision.HIGHEST if w.dtype == jnp.float32
            else jax.lax.Precision.DEFAULT)
    o_ref[...] = jnp.dot(
        xn, w, preferred_element_type=jnp.float32, precision=prec
    ).astype(o_ref.dtype)


def _choose_tile_n(n: int, d: int, itemsize: int) -> int:
    """Largest lane-aligned class tile that divides N and keeps the
    double-buffered W stream <= 16 MiB, preferring >=2 grid steps so v7x can
    shard the class axis across its two TensorCores."""
    max_tile_bytes = 8 << 20  # per buffer; Pallas double-buffers the W input
    cands = [c for c in (8192, 4096, 2048, 1024, 512, 256, 128)
             if n % c == 0 and c * d * itemsize <= max_tile_bytes]
    if not cands:
        return n  # irregular N: single full-extent block (exempt from (8,128))
    multi = [c for c in cands if n // c >= 2]
    return multi[0] if multi else cands[0]


def arcface_head(emb: jax.Array, w_blocked: jax.Array) -> jax.Array:
    """NormalizedLinear (ArcFace head) via pallas_call.

    emb:       [B, D] float embeddings (backbone output)
    w_blocked: [G, D, tile_n] pre-normalized, pre-transposed, pre-blocked W
    returns    [B, G * tile_n] cosine-similarity logits
    """
    B, D = emb.shape
    G, D_w, tile_n = w_blocked.shape
    assert D == D_w, "embedding dim mismatch"
    N = G * tile_n

    # Leading "parallel" axis with >=2 steps whenever possible: on v7x each
    # TensorCore streams half of W on its own HBM path; on v5e/v6e (1 TC) it
    # is just an outer loop costing one extra (cheap, DMA-hidden) x-norm.
    if G >= 2 and G % 2 == 0:
        n_outer, n_inner = 2, G // 2
    else:
        n_outer, n_inner = 1, G

    w_tile_bytes = D * tile_n * w_blocked.dtype.itemsize
    vmem_limit = int(min(
        max(2 * w_tile_bytes                 # double-buffered W stream
            + 2 * B * tile_n * 4             # double-buffered output tile
            + 3 * B * D * 4                  # x buffers + xn scratch
            + (8 << 20),                     # compiler headroom
            32 << 20),
        56 << 20))                           # stay inside v7x's 64 MiB VMEM

    cost = pl.CostEstimate(
        flops=2 * B * N * D,
        transcendentals=B * n_outer,         # sqrt/rcp per batch row per init
        bytes_accessed=(N * D * w_blocked.dtype.itemsize  # dominant W stream
                        + B * D * emb.dtype.itemsize
                        + B * N * 4),
    )

    return pl.pallas_call(
        _arcface_head_kernel,
        out_shape=jax.ShapeDtypeStruct((B, N), jnp.float32),
        grid_spec=pltpu.PrefetchScalarGridSpec(
            num_scalar_prefetch=0,
            grid=(n_outer, n_inner),
            in_specs=[
                # full embedding block, same index every step -> single DMA,
                # stays resident (full-array dims exempt from (8,128) rule)
                pl.BlockSpec((B, D), lambda i, j: (0, 0)),
                # one contiguous pre-blocked W slab per step
                pl.BlockSpec((pl.Squeezed(), D, tile_n),
                             lambda i, j: (i * n_inner + j, 0, 0)),
            ],
            out_specs=pl.BlockSpec((B, tile_n),
                                   lambda i, j: (0, i * n_inner + j)),
            scratch_shapes=[pltpu.VMEM((B, D), jnp.float32)],  # x_n
        ),
        compiler_params=pltpu.CompilerParams(
            dimension_semantics=("parallel", "arbitrary"),
            vmem_limit_bytes=vmem_limit,
        ),
        cost_estimate=cost,
    )(emb, w_blocked)


def xavier_uniform(key, out_features, in_features):
    """Matches torch.nn.init.xavier_uniform_ for a 2D (out, in) parameter."""
    bound = (6.0 / (in_features + out_features)) ** 0.5
    return jax.random.uniform(
        key, (out_features, in_features), dtype=jnp.float32,
        minval=-bound, maxval=bound,
    )


class ArcFaceModelJAX:
    """ArcFaceModel with use_linear=True.  Backbone is external (see TODO at
    top), so forward() consumes the 512-d embedding directly."""

    def __init__(self, num_classes: int = 256, embedding_size: int = 512,
                 seed: int = 0, weight_dtype=jnp.float32):
        key = jax.random.PRNGKey(seed)
        self.W = xavier_uniform(key, num_classes, embedding_size)  # [N, D]

        # W is fixed after __init__: hoist F.normalize(W), the transpose to
        # MXU-native [D, N], AND the per-tile blocking into contiguous
        # [G, D, tile_n] slabs (one descriptor per step's W DMA).
        # TODO(synk): if W were trainable, fold re-normalization back in as a
        #             per-column output scale instead of re-blocking per step.
        w_norm = jnp.sqrt(jnp.sum(self.W * self.W, axis=1, keepdims=True))
        w_n = self.W / jnp.maximum(w_norm, EPS)

        tile_n = _choose_tile_n(num_classes, embedding_size,
                                jnp.dtype(weight_dtype).itemsize)
        g = num_classes // tile_n
        # bf16 weight_dtype halves the HBM W stream (~2x for large N) at
        # ~1e-3 relative accuracy; default f32 keeps the 1e-5 tolerance.
        self.W_blocked = jnp.transpose(
            w_n.reshape(g, tile_n, embedding_size), (0, 2, 1)
        ).astype(weight_dtype)

        self._fwd = jax.jit(arcface_head)

    def __call__(self, emb):
        return self._fwd(emb, self.W_blocked)


if __name__ == "__main__":
    B, D, N = 2, 512, 256  # batch, embedding size (fixed by module), classes

    key = jax.random.PRNGKey(0)
    k_emb, _ = jax.random.split(key)
    # Stand-in for backbone(x): deterministic synthetic 512-d embeddings.
    emb = jax.random.normal(k_emb, (B, D), dtype=jnp.float32)

    model = ArcFaceModelJAX(num_classes=N, embedding_size=D, seed=0)
    out = jax.block_until_ready(model(emb))

    # Pure-JAX reference of NormalizedLinear for a correctness sanity check.
    x_n = emb / jnp.maximum(jnp.linalg.norm(emb, axis=1, keepdims=True), EPS)
    w_n = model.W / jnp.maximum(
        jnp.linalg.norm(model.W, axis=1, keepdims=True), EPS)
    ref = x_n @ w_n.T

    assert out.shape == (B, N)
    assert jnp.allclose(out, ref, atol=1e-5, rtol=1e-5), "mismatch vs reference"
    print("KERNEL_OK")
</pallas_src>

<mosaic_0001>
module attributes {stable_mosaic.version = 11 : i64} {
  func.func @_arcface_head_kernel(%arg0: i32, %arg1: i32, %arg2: memref<2x512xf32, #tpu.memory_space<vmem>>, %arg3: memref<1x512x128xf32, #tpu.memory_space<vmem>>, %arg4: memref<2x128xf32, #tpu.memory_space<vmem>>, %arg5: memref<2x512xf32, #tpu.memory_space<vmem>>) attributes {dimension_semantics = [#tpu.dimension_semantics<parallel>, #tpu.dimension_semantics<arbitrary>], iteration_bounds = array<i64: 2, 1>, scalar_prefetch = 0 : i64, scratch_operands = 1 : i64, tpu.core_type = #tpu.core_type<tc>, window_params = [{pipeline_mode = #tpu.pipeline_mode<synchronous>, transform_indices = @transform_0, window_bounds = array<i64: 2, 512>}, {transform_indices = @transform_1, window_bounds = array<i64: 1, 512, 128>}, {transform_indices = @transform_2, window_bounds = array<i64: 2, 128>}]} {
    %c0_i32 = arith.constant 0 : i32
    %0 = arith.cmpi eq, %arg1, %c0_i32 : i32
    %1 = arith.extui %0 : i1 to i32
    %c0_i32_0 = arith.constant 0 : i32
    %2 = arith.cmpi ne, %1, %c0_i32_0 : i32
    scf.if %2 {
      %c0_7 = arith.constant 0 : index
      %c0_8 = arith.constant 0 : index
      %8 = vector.load %arg2[%c0_7, %c0_8] : memref<2x512xf32, #tpu.memory_space<vmem>>, vector<2x512xf32>
      %9 = arith.mulf %8, %8 : vector<2x512xf32>
      %cst_9 = arith.constant dense<0.000000e+00> : vector<2xf32>
      %10 = vector.multi_reduction <add>, %9, %cst_9 [1] : vector<2x512xf32> to vector<2xf32>
      %11 = vector.shape_cast %10 : vector<2xf32> to vector<2x1xf32>
      %12 = math.sqrt %11 : vector<2x1xf32>
      %cst_10 = arith.constant 9.99999996E-13 : f32
      %13 = vector.broadcast %cst_10 : f32 to vector<2x1xf32>
      %14 = arith.maximumf %12, %13 : vector<2x1xf32>
      %cst_11 = arith.constant 1.000000e+00 : f32
      %15 = vector.broadcast %cst_11 : f32 to vector<2x1xf32>
      %16 = arith.divf %15, %14 : vector<2x1xf32>
      %17 = vector.broadcast %16 : vector<2x1xf32> to vector<2x512xf32>
      %18 = arith.mulf %8, %17 : vector<2x512xf32>
      %c0_12 = arith.constant 0 : index
      %c0_13 = arith.constant 0 : index
      %19 = vector.load %arg5[%c0_12, %c0_13] : memref<2x512xf32, #tpu.memory_space<vmem>>, vector<2x512xf32>
      tpu.vector_store %arg5[%c0_12, %c0_13], %18 {strides = array<i32>} : memref<2x512xf32, #tpu.memory_space<vmem>>, vector<2x512xf32>,
    } else {
    }
    %c0 = arith.constant 0 : index
    %c0_1 = arith.constant 0 : index
    %c0_2 = arith.constant 0 : index
    %3 = vector.load %arg3[%c0, %c0_1, %c0_2] : memref<1x512x128xf32, #tpu.memory_space<vmem>>, vector<1x512x128xf32>
    %4 = vector.shape_cast %3 : vector<1x512x128xf32> to vector<512x128xf32>
    %c0_3 = arith.constant 0 : index
    %c0_4 = arith.constant 0 : index
    %5 = vector.load %arg5[%c0_3, %c0_4] : memref<2x512xf32, #tpu.memory_space<vmem>>, vector<2x512xf32>
    %cst = arith.constant dense<0.000000e+00> : vector<2x128xf32>
    %6 = tpu.matmul %5, %4, %cst {dimension_numbers = #tpu.dot_dimension_numbers<[1], [0], [0], [1], [0, 0, 1, 1], [], []>, precision = #tpu.contract_precision<fp32>} : vector<2x512xf32>, vector<512x128xf32>, vector<2x128xf32> -> vector<2x128xf32>
    %c0_5 = arith.constant 0 : index
    %c0_6 = arith.constant 0 : index
    %7 = vector.load %arg4[%c0_5, %c0_6] : memref<2x128xf32, #tpu.memory_space<vmem>>, vector<2x128xf32>
    tpu.vector_store %arg4[%c0_5, %c0_6], %6 {strides = array<i32>} : memref<2x128xf32, #tpu.memory_space<vmem>>, vector<2x128xf32>,
    return
  }
  func.func @transform_0(%arg0: i32, %arg1: i32) -> (i32, i32) {
    %c0_i32 = arith.constant 0 : i32
    %c0_i32_0 = arith.constant 0 : i32
    %c0_i32_1 = arith.constant 0 : i32
    return %c0_i32, %c0_i32_0 : i32, i32
  }
  func.func @transform_1(%arg0: i32, %arg1: i32) -> (i32, i32, i32) {
    %c1_i32 = arith.constant 1 : i32
    %0 = arith.muli %arg0, %c1_i32 : i32
    %1 = arith.addi %0, %arg1 : i32
    %c0_i32 = arith.constant 0 : i32
    %c0_i32_0 = arith.constant 0 : i32
    %c0_i32_1 = arith.constant 0 : i32
    return %1, %c0_i32, %c0_i32_0 : i32, i32, i32
  }
  func.func @transform_2(%arg0: i32, %arg1: i32) -> (i32, i32) {
    %c1_i32 = arith.constant 1 : i32
    %0 = arith.muli %arg0, %c1_i32 : i32
    %1 = arith.addi %0, %arg1 : i32
    %c0_i32 = arith.constant 0 : i32
    %c0_i32_0 = arith.constant 0 : i32
    return %c0_i32, %1 : i32, i32
  }
}

</mosaic_0001>

<bundles_post_ra>
// kernel: arcface_head.1
= control target key start
LH: loop header
LB: loop body
LE: loop exit
PB: predicated region body
PF: predicated region fallthrough
CT: control target
= control target key end

     0   :  { %7 = vsyncpa [#allocation4], 0  ;;  %s3305_s0 = inlined_call_operand.hbm [shape: f32[2,512], index: 0, kind: input, shape index: {}]   ;;  %s3306_s1 = inlined_call_operand.hbm [shape: f32[2,512,128], index: 1, kind: input, shape index: {}]   ;;  %s3307_s2 = inlined_call_operand.hbm [shape: f32[2,256], index: 2, kind: output, shape index: {}]  }
   0x1   :  { %8 = vsyncpa [#allocation7], 0 }
   0x2   :  { %10 = vsyncpa [#allocation7 + $0x1], 0 }
   0x3   :  { %11 = vsyncpa [#allocation5], 0 }
   0x4   :  { %13 = vsyncpa [#allocation5 + $0x1], 0  ;;  %s2073_s9 = smov 0   ;;  %s2075_s10 = smov 0  }
   0x5   :  { %s2077_s11 = smov 0   ;;  %s2079_s12 = smov 0  }
   0x6   :  { %s2081_s13 = smov 0   ;;  %s2083_s14 = smov 0  }
   0x7 LB: > { %s1809_s15 = sadd.s32 4294967295, %s2052_s14   ;;  %s1810_s16 = sadd.s32 4294967294, %s2052_s14   ;;  %s2052_s14 = sphi %s2083_s14, %s19_s14   ;;  %s2048_s13 = sphi %s2081_s13, %s3389_s13   ;;  %s2044_s12 = sphi %s2079_s12, %s3388_s12   ;;  %s2040_s11 = sphi %s2077_s11, %s3387_s11   ;;  %s2036_s10 = sphi %s2075_s10, %s3386_s10   ;;  %s2032_s9 = sphi %s2073_s9, %s3385_s9  }
   0x8   : > { %s61_s17 = sadd.s32 1, %s2040_s11  ;;  %p68_p0 = scmp.ne.s32.totalorder %s2040_s11, %s2036_s10 }
   0x9   : > { %p69_p1 = scmp.eq.s32.totalorder %s2052_s14, 0  ;;  %p74_p2 = scmp.ne.s32.totalorder %s2036_s10, %s2032_s9 }
   0xa   : > { %p2111_p3 = scmp.eq.s32.totalorder %s1809_s15, 0  ;;  %p100_p4 = scmp.eq.s32.totalorder %s1809_s15, 1 }
   0xb   : > { %p2115_p5 = por %p69_p1, %p68_p0  ;;  %p106_p6 = scmp.eq.s32.totalorder %s1810_s16, 1 }
   0xc   : > { %p2121_p7 = por %p2111_p3, %p74_p2  ;;  %p2125_p8 = por %p100_p4, %p68_p0 }
   0xd   : > { %p2129_p9 = por %p106_p6, %p74_p2  ;;  %p1811_p10 = scmp.ge.s32.totalorder %s2052_s14, 1 }
   0xe   : > { %p113_p11 = scmp.lt.s32.totalorder %s2052_s14, 3  ;;  %s125_s25 = sshll.u32 %s3305_s0, 4  ;;  %s126_s25 = int_to_ptr.hbm [resolvable:$true] %s125_s25 }
   0xf   : > { %s2054_s27 = smov [#allocation3]   ;;  %p1813_p13 = scmp.ge.s32.totalorder %s2052_s14, 2 }
  0x10   : > { %p2138_p12 = pnand %p1811_p10, %p113_p11  ;;  %s127_s28 = sshll.u32 %s2054_s27, 4  ;;  %s128_s28 = int_to_ptr.vmem [resolvable:$true] %s127_s28 }
  0x11   : > { %p1847_p1 = scmp.lt.s32.totalorder %s2052_s14, 2  ;;  %s31_s30 = sadd.s32 1, %s2048_s13 }
  0x12   : > { %p1834_p0 = pneg %p2138_p12  ;;  %p33_p6 = scmp.ge.s32.totalorder %s31_s30, 2 }
  0x13   : > { %p2150_p4 = pnand %p1847_p1, %p2115_p5  ;;  %s138_s3 = sand.u32 1, %s2040_s11  }
  0x14   : > { %p1835_p2 = pnand %p1834_p0, %p2111_p3  ;;  %s3391_s30 = smov (%p33_p6, %s31_s30), 0 }
  0x15   : > { %s1814_s4 = sshll.u32 %s138_s3, 9  ;;  %s58_s5 = ssub.s32 %s2048_s13, %s3391_s30 }
  0x16   : > { %1837 = dma.hbm_to_vmem [thread:$0]  (!%p1835_p2), %s126_s25, 128, %s128_s28, [#allocation4]  }
  0x17   : > { %p59_p10 = scmp.eq.s32.totalorder %s58_s5, 0  ;;  %s1825_s6 = sshll.u32 %s2048_s13, 9 }
  0x18   : > { %s148_s15 = scalar_lea.hbm %s3306_s1, %s1825_s6  ;;  %s142_s16 = scalar_lea.vmem [#allocation6], %s1814_s4 }
  0x19   : > { %s151_s19 = sshll.u32 %s142_s16, 4  ;;  %s149_s24 = sshll.u32 %s148_s15, 4  ;;  %s152_s19 = int_to_ptr.vmem [resolvable:$true] %s151_s19  ;;  %s150_s24 = int_to_ptr.hbm [resolvable:$true] %s149_s24 }
  0x1a   : > { %s2167_s23 = scalar_select %p59_p10, %s2040_s11, %s61_s17  }
  0x1b   : > { %s139_s25 = scalar_lea.sflag [#allocation7], %s138_s3  ;;  %s2055_s27 = smov 128  }
  0x1c   : > { %s2056_s28 = smov 8   ;;  %163 = sbr.rel (%p2138_p12) target bundleno = 509 (0x1fd), region = 28 }
  0x1d   : > { %1841 = dma.hbm_to_vmem [thread:$0]  (!%p2150_p4), %s150_s24, 8192, %s152_s19, %s139_s25, %s2055_s27, %s2055_s27, %s2056_s28  }
  0x21   : > { %2019 = dma.done.wait (%p2111_p3), [#allocation4], 128  }
  0x22   : > { %2021 = vsyncadd (%p2111_p3), [#allocation4], 4294967168  ;;  %s2178_s17 = sand.u32 1, %s2036_s10  }
  0x23   : > { %s1819_s3 = sshll.u32 %s2178_s17, 9  ;;  %s171_s4 = scalar_lea.sflag [#allocation7], %s2178_s17 }
  0x24   : > { %s2182_s5 = scalar_lea.vmem [#allocation6], %s1819_s3 }
  0x25   : > { %2023 = dma.done.wait (%p2121_p7), %s171_s4, 8192  }
  0x26   : > { %2025 = vsyncadd (%p2121_p7), %s171_s4, 4294959104  ;;  %v2188_v0 = vld [vmem:[#allocation3] sm:$0xff]  ;;  %v274_v2 = vld [vmem:[%s2182_s5 + $0x70] sm:$0xff]  ;;  %vm214_vm0 = vcmask 1041408   ;;  %s1820_s18 = sshll.u32 %s2178_s17, 1  ;;  %s1822_s20 = sshll.u32 %s2044_s12, 1 }
  0x27   : > { %v275_v1 = vld [vmem:[%s2182_s5 + $0x78] sm:$0xff]  ;;  %v203_v3 = vmul.f32 %v2188_v0, %v2188_v0  ;;  %v2196_v5 = vand.u32 4294901760, %v274_v2  ;;  %v273_v6 = vld [vmem:[%s2182_s5 + $0x68] sm:$0xff]  ;;  %v272_v7 = vld [vmem:[%s2182_s5 + $0x60] sm:$0xff]  ;;  %s1712_s6 = scalar_lea.hbm %s3307_s2, %s1822_s20  ;;  %s195_s7 = scalar_lea.vmem [#allocation8], %s1820_s18 }
  0x28   : > { %v2194_v4 = vand.u32 4294901760, %v275_v1  ;;  %v2200_v8 = vand.u32 4294901760, %v273_v6  ;;  %v2202_v9 = vand.u32 4294901760, %v272_v7  ;;  %v271_v37 = vld [vmem:[%s2182_s5 + $0x58] sm:$0xff]  ;;  %v270_v39 = vld [vmem:[%s2182_s5 + $0x50] sm:$0xff]  ;;  %v269_v42 = vld [vmem:[%s2182_s5 + $0x48] sm:$0xff] }
  0x29   : > { %205 = vst [vmem:[#allocation1] ss:$4 sm:$0xff] %v203_v3  ;;  %v2208_v11 = vsub.f32 %v274_v2, %v2196_v5  ;;  %v2249_v38 = vand.u32 4294901760, %v271_v37  ;;  %v2255_v41 = vand.u32 4294901760, %v270_v39  ;;  %v2265_v45 = vand.u32 4294901760, %v269_v42  ;;  %v268_v46 = vld [vmem:[%s2182_s5 + $0x40] sm:$0xff] }
  0x2a   : > { %v2205_v10 = vsub.f32 %v275_v1, %v2194_v4  ;;  %532 = vmatpush.msra.mxu3 %v2194_v4  ;;  %336 = vmatpush.msra.mxu0 %v2194_v4  ;;  %v2213_v12 = vsub.f32 %v273_v6, %v2200_v8  ;;  %v2216_v13 = vsub.f32 %v272_v7, %v2202_v9  ;;  %v2278_v50 = vand.u32 4294901760, %v268_v46  ;;  %v267_v51 = vld [vmem:[%s2182_s5 + $0x38] sm:$0xff]  ;;  %v266_v57 = vld [vmem:[%s2182_s5 + $0x30] sm:$0xff]  ;;  %v265_v63 = vld [vmem:[%s2182_s5 + $0x28] sm:$0xff]  ;;  %s1714_s8 = sshll.u32 %s195_s7, 4  ;;  %s1716_s15 = sshll.u32 %s1712_s6, 4  ;;  %s1715_s8 = int_to_ptr.vmem [resolvable:$true] %s1714_s8  ;;  %s1717_s15 = int_to_ptr.hbm [resolvable:$true] %s1716_s15 }
  0x2b   : > { %v384_v15 = vand.u32 4294901760, %v2208_v11  ;;  %v2253_v40 = vsub.f32 %v271_v37, %v2249_v38  ;;  %v2262_v44 = vsub.f32 %v270_v39, %v2255_v41  ;;  %v2275_v49 = vsub.f32 %v269_v42, %v2265_v45  ;;  %s1701_s12 = scalar_lea.sflag [#allocation5], %s2178_s17  ;;  %s1980_s16 = sshra.s32 %s1717_s15, 4  ;;  %s1981_s16 = int_to_ptr.hbm [resolvable:$true] %s1980_s16 }
  0x2c   : > { %v378_v14 = vand.u32 4294901760, %v2205_v10  ;;  %479 = vmatpush.msra.mxu2 %v2205_v10  ;;  %534 = vmatpush.msra.mxu3 %v2196_v5  ;;  %v390_v16 = vand.u32 4294901760, %v2213_v12  ;;  %v396_v17 = vand.u32 4294901760, %v2216_v13  ;;  %v2288_v55 = vsub.f32 %v268_v46, %v2278_v50  ;;  %s1982_s19 = scalar_lea.hbm %s1981_s16, 2  ;;  %s1986_s27 = scalar_lea.hbm %s3307_s2, 4 }
  0x2d   : > { %338 = vmatpush.msra.mxu0 %v2196_v5  ;;  %v385_v19 = vsub.f32 %v2208_v11, %v384_v15  ;;  %v402_v43 = vand.u32 4294901760, %v2253_v40  ;;  %v408_v48 = vand.u32 4294901760, %v2262_v44  ;;  %v414_v54 = vand.u32 4294901760, %v2275_v49  ;;  %p1983_p3 = scmp.ne.s32.totalorder %s1981_s16, %s1982_s19  ;;  %p1987_p11 = scmp.lt.s32.totalorder %s1981_s16, %s3307_s2 }
  0x2e   : > { %v379_v18 = vsub.f32 %v2205_v10, %v378_v14  ;;  %482 = vmatpush.msra.mxu2 %v2208_v11  ;;  %536 = vmatpush.msra.mxu3 %v2200_v8  ;;  %v391_v22 = vsub.f32 %v2213_v12, %v390_v16  ;;  %v397_v23 = vsub.f32 %v2216_v13, %v396_v17  ;;  %v2292_v56 = vand.u32 4294901760, %v267_v51  ;;  %p1988_p12 = scmp.lt.s32.totalorder %s1986_s27, %s1982_s19 }
  0x2f   : > { %340 = vmatpush.msra.mxu0 %v2200_v8  ;;  %v386_v21 = vand.u32 4294901760, %v385_v19  ;;  %v403_v47 = vsub.f32 %v2253_v40, %v402_v43  ;;  %v409_v53 = vsub.f32 %v2262_v44, %v408_v48  ;;  %v415_v59 = vsub.f32 %v2275_v49, %v414_v54  ;;  %p1984_p5 = pnand %p1983_p3, %p2125_p8 }
  0x30   : > { %v380_v20 = vand.u32 4294901760, %v379_v18  ;;  %485 = vmatpush.msra.mxu2 %v2213_v12  ;;  %538 = vmatpush.msra.mxu3 %v2202_v9  ;;  %v206_v24 = vld.sshfl [vmem:[#allocation1] sm:$0xff pattern:$0x73625140]  ;;  %v392_v32 = vand.u32 4294901760, %v391_v22  ;;  %v398_v33 = vand.u32 4294901760, %v397_v23  ;;  %v2304_v62 = vsub.f32 %v267_v51, %v2292_v56  ;;  %p1989_p0 = por %p1988_p12, %p1987_p11 }
  0x31   : > { %v207_v25 = vld.sshfl [vmem:[#allocation1 + $0x8] sm:$0xff pattern:$0x73625140]  ;;  %342 = vmatpush.msra.mxu0 %v2202_v9  ;;  %v208_v26 = vld.sshfl [vmem:[#allocation1 + $0x10] sm:$0xff pattern:$0x73625140]  ;;  %p1985_p7 = pneg %p1984_p5 }
  0x32   : > { %v209_v27 = vld.sshfl [vmem:[#allocation1 + $0x18] sm:$0xff pattern:$0x73625140]  ;;  %381 = vmatpush.msra.mxu1 %v380_v20  ;;  %488 = vmatpush.msra.mxu2 %v2216_v13  ;;  %v215_v28 = vsel %vm214_vm0, %v206_v24, 0.0  ;;  %v216_v29 = vsel %vm214_vm0, %v207_v25, 0.0  ;;  %v218_v30 = vsel %vm214_vm0, %v208_v26, 0.0 }
  0x33   : > { %v217_v31 = vadd.f32 %v216_v29, %v215_v28  ;;  %v220_v34 = vsel %vm214_vm0, %v209_v27, 0.0  ;;  %540 = vmatpush.msra.mxu3 %v2249_v38  ;;  %344 = vmatpush.msra.mxu0 %v2249_v38  ;;  %v404_v52 = vand.u32 4294901760, %v403_v47  ;;  %v410_v58 = vand.u32 4294901760, %v409_v53  ;;  %v264_v18 = vld [vmem:[%s2182_s5 + $0x20] sm:$0xff]  ;;  %v263_v24 = vld [vmem:[%s2182_s5 + $0x18] sm:$0xff]  ;;  %p1990_p1 = pnand %p1989_p0, %p1985_p7 }
  0x34   : > { %387 = vmatpush.msra.mxu1 %v386_v21  ;;  %491 = vmatpush.msra.mxu2 %v2253_v40  ;;  %v420_v60 = vand.u32 4294901760, %v2288_v55  ;;  %v2301_v61 = vand.u32 4294901760, %v266_v57  ;;  %v416_v1 = vand.u32 4294901760, %v415_v59  ;;  %v2315_v6 = vand.u32 4294901760, %v265_v63  ;;  %v260_v51 = vld [vmem:[%s2182_s5] sm:$0xff]  ;;  %v285_v40 = vld [vmem:[%s2182_s5 + $0xc8] sm:$0xff] }
  0x35   : > { %v219_v35 = vadd.f32 %v218_v30, %v217_v31  ;;  %542 = vmatpush.msra.mxu3 %v2255_v41  ;;  %346 = vmatpush.msra.mxu0 %v2255_v41  ;;  %v426_v7 = vand.u32 4294901760, %v2304_v62  ;;  %v2325_v22 = vand.u32 4294901760, %v264_v18  ;;  %v2341_v28 = vand.u32 4294901760, %v263_v24  ;;  %v262_v30 = vld [vmem:[%s2182_s5 + $0x10] sm:$0xff] }
  0x36   : > { %393 = vmatpush.msra.mxu1 %v392_v32  ;;  %494 = vmatpush.msra.mxu2 %v2262_v44  ;;  %v421_v2 = vsub.f32 %v2288_v55, %v420_v60  ;;  %v2313_v3 = vsub.f32 %v266_v57, %v2301_v61  ;;  %v2323_v21 = vsub.f32 %v265_v63, %v2315_v6  ;;  %v284_v44 = vld [vmem:[%s2182_s5 + $0xc0] sm:$0xff] }
  0x37   : > { %v221_v36 = vadd.f32 %v220_v34, %v219_v35  ;;  %544 = vmatpush.msra.mxu3 %v2265_v45  ;;  %348 = vmatpush.msra.mxu0 %v2265_v45  ;;  %v427_v23 = vsub.f32 %v2304_v62, %v426_v7  ;;  %v2339_v27 = vsub.f32 %v264_v18, %v2325_v22  ;;  %v2356_v35 = vand.u32 4294901760, %v262_v30 }
  0x38   : > { %399 = vmatpush.msra.mxu1 %v398_v33  ;;  %497 = vmatpush.msra.mxu2 %v2275_v49  ;;  %v422_v19 = vand.u32 4294901760, %v421_v2  ;;  %v432_v20 = vand.u32 4294901760, %v2313_v3  ;;  %v438_v26 = vand.u32 4294901760, %v2323_v21  ;;  %v2352_v34 = vsub.f32 %v263_v24, %v2341_v28  ;;  %v291_v24 = vld [vmem:[%s2182_s5 + $0xf8] sm:$0xff] }
  0x39   : > { %222 = vadd.xlane.f32.xlu0 %v221_v36  ;;  %546 = vmatpush.msra.mxu3 %v2278_v50  ;;  %v428_v29 = vand.u32 4294901760, %v427_v23  ;;  %v444_v33 = vand.u32 4294901760, %v2339_v27  ;;  %v261_v36 = vld [vmem:[%s2182_s5 + $0x8] sm:$0xff]  ;;  %v2368_v47 = vsub.f32 %v262_v30, %v2356_v35  ;;  %v283_v49 = vld [vmem:[%s2182_s5 + $0xb8] sm:$0xff] }
  0x3a   : > { %350 = vmatpush.msra.mxu0 %v2278_v50  ;;  %405 = vmatpush.msra.mxu1 %v404_v52  ;;  %v433_v25 = vsub.f32 %v2313_v3, %v432_v20  ;;  %v439_v32 = vsub.f32 %v2323_v21, %v438_v26  ;;  %v450_v42 = vand.u32 4294901760, %v2352_v34  ;;  %v2363_v46 = vand.u32 4294901760, %v261_v36 }
  0x3b   : > { %500 = vmatpush.msra.mxu2 %v2288_v55  ;;  %548 = vmatpush.msra.mxu3 %v2292_v56  ;;  %v445_v39 = vsub.f32 %v2339_v27, %v444_v33  ;;  %v456_v59 = vand.u32 4294901760, %v2368_v47  ;;  %v282_v55 = vld [vmem:[%s2182_s5 + $0xb0] sm:$0xff] }
  0x3c   : > { %352 = vmatpush.msra.mxu0 %v2292_v56  ;;  %411 = vmatpush.msra.mxu1 %v410_v58  ;;  %v434_v31 = vand.u32 4294901760, %v433_v25  ;;  %v440_v37 = vand.u32 4294901760, %v439_v32  ;;  %v451_v53 = vsub.f32 %v2352_v34, %v450_v42  ;;  %v2376_v57 = vsub.f32 %v261_v36, %v2363_v46  ;;  %v290_v32 = vld [vmem:[%s2182_s5 + $0xf0] sm:$0xff] }
  0x3d   : > { %503 = vmatpush.msra.mxu2 %v2304_v62  ;;  %550 = vmatpush.msra.mxu3 %v2301_v61  ;;  %v446_v52 = vand.u32 4294901760, %v445_v39  ;;  %v2378_v58 = vand.u32 4294901760, %v260_v51  ;;  %v457_v18 = vsub.f32 %v2368_v47, %v456_v59  ;;  %v2411_v36 = vand.u32 4294901760, %v290_v32  ;;  %v281_v62 = vld [vmem:[%s2182_s5 + $0xa8] sm:$0xff] }
  0x3e   : > { %417 = vmatpush.msra.mxu1 %v416_v1  ;;  %354 = vmatpush.msra.mxu0 %v2301_v61  ;;  %v452_v63 = vand.u32 4294901760, %v451_v53  ;;  %v462_v1 = vand.u32 4294901760, %v2376_v57  ;;  %v288_v53 = vld [vmem:[%s2182_s5 + $0xe0] sm:$0xff] }
  0x3f   : > { %506 = vmatpush.msra.mxu2 %v2313_v3  ;;  %552 = vmatpush.msra.mxu3 %v2315_v6  ;;  %v2386_v2 = vsub.f32 %v260_v51, %v2378_v58  ;;  %v458_v25 = vand.u32 4294901760, %v457_v18  ;;  %v289_v51 = vld [vmem:[%s2182_s5 + $0xe8] sm:$0xff] }
  0x40   : > { %423 = vmatpush.msra.mxu1 %v422_v19  ;;  %356 = vmatpush.msra.mxu0 %v2315_v6  ;;  %v463_v19 = vsub.f32 %v2376_v57, %v462_v1 }
  0x41   : > { %509 = vmatpush.msra.mxu2 %v2323_v21  ;;  %554 = vmatpush.msra.mxu3 %v2325_v22  ;;  %v468_v23 = vand.u32 4294901760, %v2386_v2 }
  0x42   : > { %358 = vmatpush.msra.mxu0 %v2325_v22  ;;  %429 = vmatpush.msra.mxu1 %v428_v29  ;;  %v2402_v29 = vand.u32 4294901760, %v291_v24  ;;  %v464_v30 = vand.u32 4294901760, %v463_v19  ;;  %v287_v19 = vld [vmem:[%s2182_s5 + $0xd8] sm:$0xff] }
  0x43   : > { %512 = vmatpush.msra.mxu2 %v2339_v27  ;;  %556 = vmatpush.msra.mxu3 %v2341_v28 }
  0x44   : > { %360 = vmatpush.msra.mxu0 %v2341_v28  ;;  %435 = vmatpush.msra.mxu1 %v434_v31  ;;  %v469_v31 = vsub.f32 %v2386_v2, %v468_v23 }
  0x45   : > { %515 = vmatpush.msra.mxu2 %v2352_v34  ;;  %558 = vmatpush.msra.mxu3 %v2356_v35 }
  0x46   : > { %362 = vmatpush.msra.mxu0 %v2356_v35  ;;  %441 = vmatpush.msra.mxu1 %v440_v37  ;;  %v2414_v37 = vsub.f32 %v291_v24, %v2402_v29  ;;  %v470_v39 = vand.u32 4294901760, %v469_v31 }
  0x47   : > { %518 = vmatpush.msra.mxu2 %v2368_v47  ;;  %560 = vmatpush.msra.mxu3 %v2363_v46 }
  0x48   : > { %364 = vmatpush.msra.mxu0 %v2363_v46  ;;  %447 = vmatpush.msra.mxu1 %v446_v52  ;;  %v719_v10 = vand.u32 4294901760, %v2414_v37  ;;  %v2424_v52 = vsub.f32 %v290_v32, %v2411_v36 }
  0x49   : > { %521 = vmatpush.msra.mxu2 %v2376_v57  ;;  %562 = vmatpush.msra.mxu3 %v2378_v58 }
  0x4a   : > { %366 = vmatpush.msra.mxu0 %v2378_v58  ;;  %453 = vmatpush.msra.mxu1 %v452_v63  ;;  %v720_v11 = vsub.f32 %v2414_v37, %v719_v10  ;;  %v2434_v63 = vand.u32 4294901760, %v288_v53 }
  0x4b   : > { %524 = vmatpush.msra.mxu2 %v2386_v2 }
  0x4c   : > { %573 = vmatpush.msrb.mxu0 %v378_v14  ;;  %459 = vmatpush.msra.mxu1 %v458_v25  ;;  %v2421_v14 = vand.u32 4294901760, %v289_v51  ;;  %v721_v12 = vand.u32 4294901760, %v720_v11  ;;  %v2448_v25 = vand.u32 4294901760, %v287_v19 }
  0x4d   : > { %677 = vmatpush.msrb.mxu2 %v2402_v29 }
  0x4e   : > { %577 = vmatpush.msrb.mxu0 %v384_v15  ;;  %465 = vmatpush.msra.mxu1 %v464_v30  ;;  %v725_v15 = vand.u32 4294901760, %v2424_v52  ;;  %v2437_v18 = vsub.f32 %v289_v51, %v2421_v14  ;;  %v286_v30 = vld [vmem:[%s2182_s5 + $0xd0] sm:$0xff]  ;;  %v2473_v51 = vand.u32 4294901760, %v285_v40 }
  0x4f   : > { %679 = vmatpush.msrb.mxu2 %v2411_v36  ;;  %722 = vmatpush.msrb.mxu3 %v721_v12  ;;  %v2461_v31 = vand.u32 4294901760, %v286_v30 }
  0x50   : > { %581 = vmatpush.msrb.mxu0 %v390_v16  ;;  %471 = vmatpush.msra.mxu1 %v470_v39  ;;  %v726_v16 = vsub.f32 %v2424_v52, %v725_v15  ;;  %v731_v24 = vand.u32 4294901760, %v2437_v18  ;;  %v2495_v12 = vsub.f32 %v285_v40, %v2473_v51 }
  0x51   : > { %681 = vmatpush.msrb.mxu2 %v2421_v14 }
  0x52   : > { %640 = vmatpush.msrb.mxu1 %v2194_v4  ;;  %585 = vmatpush.msrb.mxu0 %v396_v17  ;;  %v2452_v4 = vsub.f32 %v288_v53, %v2434_v63  ;;  %v727_v13 = vand.u32 4294901760, %v726_v16  ;;  %v732_v17 = vsub.f32 %v2437_v18, %v731_v24  ;;  %v2476_v53 = vsub.f32 %v286_v30, %v2461_v31 }
  0x53   : > { %683 = vmatpush.msrb.mxu2 %v2434_v63 }
  0x54   : > { %642 = vmatpush.msrb.mxu1 %v2196_v5  ;;  %589 = vmatpush.msrb.mxu0 %v402_v43  ;;  %v2464_v5 = vsub.f32 %v287_v19, %v2448_v25  ;;  %v737_v32 = vand.u32 4294901760, %v2452_v4  ;;  %v733_v43 = vand.u32 4294901760, %v732_v17  ;;  %v2492_v19 = vand.u32 4294901760, %v284_v44 }
  0x55   : > { %685 = vmatpush.msrb.mxu2 %v2448_v25  ;;  %728 = vmatpush.msrb.mxu3 %v727_v13  ;;  %v3311_v13 = vand.u32 4294901760, %v2495_v12  ;;  %v2508_v17 = vand.u32 4294901760, %v283_v49 }
  0x56   : > { %644 = vmatpush.msrb.mxu1 %v2200_v8  ;;  %593 = vmatpush.msrb.mxu0 %v408_v48  ;;  %v743_v39 = vand.u32 4294901760, %v2464_v5  ;;  %v738_v8 = vsub.f32 %v2452_v4, %v737_v32 }
  0x57   : > { %687 = vmatpush.msrb.mxu2 %v2461_v31  ;;  %734 = vmatpush.msrb.mxu3 %v733_v43  ;;  %v756_v40 = vsub.f32 %v2495_v12, %v3311_v13  ;;  %v2519_v43 = vand.u32 4294901760, %v282_v55 }
  0x58   : > { %646 = vmatpush.msrb.mxu1 %v2202_v9  ;;  %597 = vmatpush.msrb.mxu0 %v414_v54  ;;  %v744_v11 = vsub.f32 %v2464_v5, %v743_v39  ;;  %v749_v9 = vand.u32 4294901760, %v2476_v53  ;;  %v739_v54 = vand.u32 4294901760, %v738_v8  ;;  %v2525_v8 = vsub.f32 %v283_v49, %v2508_v17 }
  0x59   : > { %689 = vmatpush.msrb.mxu2 %v2473_v51 }
  0x5a   : > { %648 = vmatpush.msrb.mxu1 %v2249_v38  ;;  %601 = vmatpush.msrb.mxu0 %v420_v60  ;;  %v745_v16 = vand.u32 4294901760, %v744_v11  ;;  %v750_v30 = vsub.f32 %v2476_v53, %v749_v9  ;;  %v2511_v38 = vsub.f32 %v284_v44, %v2492_v19  ;;  %v2528_v44 = vand.u32 4294901760, %v281_v62 }
  0x5b   : > { %691 = vmatpush.msrb.mxu2 %v2492_v19  ;;  %740 = vmatpush.msrb.mxu3 %v739_v54  ;;  %v2531_v11 = vsub.f32 %v282_v55, %v2519_v43  ;;  %v3310_v49 = vand.u32 4294901760, %v2525_v8 }
  0x5c   : > { %650 = vmatpush.msrb.mxu1 %v2255_v41  ;;  %605 = vmatpush.msrb.mxu0 %v426_v7  ;;  %v751_v60 = vand.u32 4294901760, %v750_v30  ;;  %v3308_v41 = vand.u32 4294901760, %v2511_v38  ;;  %v757_v7 = vand.u32 4294901760, %v756_v40 }
  0x5d   : > { %693 = vmatpush.msrb.mxu2 %v2508_v17  ;;  %746 = vmatpush.msrb.mxu3 %v745_v16  ;;  %v280_v16 = vld [vmem:[%s2182_s5 + $0xa0] sm:$0xff]  ;;  %v3309_v55 = vand.u32 4294901760, %v2531_v11  ;;  %v768_v40 = vsub.f32 %v2525_v8, %v3310_v49 }
  0x5e   : > { %652 = vmatpush.msrb.mxu1 %v2265_v45  ;;  %609 = vmatpush.msrb.mxu0 %v432_v20  ;;  %v762_v45 = vsub.f32 %v2511_v38, %v3308_v41  ;;  %v2544_v3 = vand.u32 4294901760, %v280_v16  ;;  %v2547_v20 = vsub.f32 %v281_v62, %v2528_v44 }
  0x5f   : > { %695 = vmatpush.msrb.mxu2 %v2519_v43  ;;  %752 = vmatpush.msrb.mxu3 %v751_v60  ;;  %v279_v60 = vld [vmem:[%s2182_s5 + $0x98] sm:$0xff]  ;;  %v774_v62 = vsub.f32 %v2531_v11, %v3309_v55 }
  0x60   : > { %654 = vmatpush.msrb.mxu1 %v2278_v50  ;;  %613 = vmatpush.msrb.mxu0 %v438_v26  ;;  %v763_v50 = vand.u32 4294901760, %v762_v45  ;;  %v779_v21 = vand.u32 4294901760, %v2547_v20  ;;  %v2561_v26 = vand.u32 4294901760, %v279_v60  ;;  %v2568_v45 = vsub.f32 %v280_v16, %v2544_v3 }
  0x61   : > { %697 = vmatpush.msrb.mxu2 %v2528_v44  ;;  %758 = vmatpush.msrb.mxu3 %v757_v7  ;;  %v278_v7 = vld [vmem:[%s2182_s5 + $0x90] sm:$0xff]  ;;  %v775_v55 = vand.u32 4294901760, %v774_v62 }
  0x62   : > { %656 = vmatpush.msrb.mxu1 %v2292_v56  ;;  %617 = vmatpush.msrb.mxu0 %v444_v33  ;;  %v769_v56 = vand.u32 4294901760, %v768_v40  ;;  %v780_v49 = vsub.f32 %v2547_v20, %v779_v21  ;;  %v2574_v13 = vand.u32 4294901760, %v278_v7  ;;  %v2582_v27 = vsub.f32 %v279_v60, %v2561_v26  ;;  %v277_v33 = vld [vmem:[%s2182_s5 + $0x88] sm:$0xff]  ;;  %v276_v60 = vld [vmem:[%s2182_s5 + $0x80] sm:$0xff] }
  0x63   : > { %699 = vmatpush.msrb.mxu2 %v2544_v3  ;;  %764 = vmatpush.msrb.mxu3 %v763_v50  ;;  %v2585_v50 = vand.u32 4294901760, %v277_v33 }
  0x64   : > { %658 = vmatpush.msrb.mxu1 %v2301_v61  ;;  %621 = vmatpush.msrb.mxu0 %v450_v42  ;;  %v785_v61 = vand.u32 4294901760, %v2568_v45  ;;  %v781_v16 = vand.u32 4294901760, %v780_v49  ;;  %v2588_v40 = vsub.f32 %v278_v7, %v2574_v13  ;;  %v791_v34 = vand.u32 4294901760, %v2582_v27 }
  0x65   : > { %701 = vmatpush.msrb.mxu2 %v2561_v26  ;;  %770 = vmatpush.msrb.mxu3 %v769_v56 }
  0x66   : > { %660 = vmatpush.msrb.mxu1 %v2315_v6  ;;  %625 = vmatpush.msrb.mxu0 %v456_v59  ;;  %v786_v6 = vsub.f32 %v2568_v45, %v785_v61  ;;  %v797_v49 = vand.u32 4294901760, %v2588_v40  ;;  %v2607_v59 = vand.u32 4294901760, %v276_v60 }
  0x67   : > { %703 = vmatpush.msrb.mxu2 %v2574_v13  ;;  %776 = vmatpush.msrb.mxu3 %v775_v55 }
  0x68   : > { %662 = vmatpush.msrb.mxu1 %v2325_v22  ;;  %629 = vmatpush.msrb.mxu0 %v462_v1  ;;  %v787_v47 = vand.u32 4294901760, %v786_v6  ;;  %v792_v22 = vsub.f32 %v2582_v27, %v791_v34  ;;  %v2624_v56 = vsub.f32 %v276_v60, %v2607_v59  ;;  %v2057_v60 = vmov 269488144  }
  0x69   : > { %705 = vmatpush.msrb.mxu2 %v2585_v50  ;;  %782 = vmatpush.msrb.mxu3 %v781_v16 }
  0x6a   : > { %664 = vmatpush.msrb.mxu1 %v2341_v28  ;;  %v798_v28 = vsub.f32 %v2588_v40, %v797_v49  ;;  %633 = vmatpush.msrb.mxu0 %v468_v23  ;;  %v793_v1 = vand.u32 4294901760, %v792_v22  ;;  %v809_v23 = vand.u32 4294901760, %v2624_v56 }
  0x6b   : > { %707 = vmatpush.msrb.mxu2 %v2607_v59  ;;  %788 = vmatpush.msrb.mxu3 %v787_v47  ;;  %v254_v47 = vunpack.c.l.s4 %v2057_v60 }
  0x6c   : > { %666 = vmatpush.msrb.mxu1 %v2356_v35 }
  0x6d   : > { %794 = vmatpush.msrb.mxu3 %v793_v1 }
  0x6e   : > { %668 = vmatpush.msrb.mxu1 %v2363_v46 }
  0x70   : > { %670 = vmatpush.msrb.mxu1 %v2378_v58 }
  0xac   : > { %v2485_v48 = vpop.xlane.xlu0 %222 }
  0xad   : > { %1902 = vrsqrt.f32 %v2485_v48  ;;  %vm231_vm1 = vcmp.eq.f32.partialorder %v2485_v48, inf  ;;  %v234_v57 = vand.u32 2147483648, %v2485_v48  ;;  %vm233_vm2 = vcmp.eq.f32.partialorder %v2485_v48, 0.0 }
  0xb3   : > { %v1903_v54 = vpop.eup %1902 }
  0xb4   : > { %v225_v30 = vmul.f32 %v1903_v54, %v2485_v48 }
  0xb6   : > { %v226_v41 = vmul.f32 %v1903_v54, %v225_v30 }
  0xb8   : > { %v227_v30 = vmul.f32 0.5, %v226_v41 }
  0xba   : > { %v228_v41 = vsub.f32 1.5, %v227_v30  ;;  %v799_v30 = vand.u32 4294901760, %v798_v28 }
  0xbc   : > { %v229_v42 = vmul.f32 %v1903_v54, %v228_v41  ;;  %v2610_v54 = vsub.f32 %v277_v33, %v2585_v50  ;;  %800 = vmatpush.msrb.mxu3 %v799_v30 }
  0xbe   : > { %v230_v55 = vmul.f32 %v229_v42, %v2485_v48  ;;  %v803_v62 = vand.u32 4294901760, %v2610_v54 }
  0xc0   : > { %v232_v7 = vsel %vm231_vm1, %v2485_v48, %v230_v55  ;;  %v804_v35 = vsub.f32 %v2610_v54, %v803_v62  ;;  %v810_v48 = vsub.f32 %v2624_v56, %v809_v23 }
  0xc1   : > { %v235_v2 = vsel %vm233_vm2, %v234_v57, %v232_v7  ;;  %v255_v57 = vunpack.c.0.s8 %v254_v47 }
  0xc2   : > { %v236_v33 = vmax.f32 %v235_v2, 1e-12  ;;  %v805_v41 = vand.u32 4294901760, %v804_v35  ;;  %v811_v16 = vand.u32 4294901760, %v810_v48 }
  0xc4   : > { %1904 = vrcp.f32 %v236_v33  ;;  %806 = vmatpush.msrb.mxu3 %v805_v41  ;;  %v248_v22 = vand.u32 2147483648, %v236_v33  ;;  %v246_v28 = vand.u32 2147483647, %v236_v33  ;;  %vm242_vm4 = vweird.f32 %v236_v33 }
  0xc6   : > { %812 = vmatpush.msrb.mxu3 %v811_v16  ;;  %v249_v1 = vor.u32 1.1754944e-38, %v248_v22  ;;  %vm247_vm6 = vcmp.eq.f32.partialorder %v246_v28, 8.507059e+37 }
  0xca   : > { %v1905_v46 = vpop.eup %1904 }
  0xcb   : > { %v238_v6 = vmul.f32 %v1905_v46, %v236_v33  ;;  %vm243_vm3 = vweird.f32 %v1905_v46 }
  0xcc   : > { %vm244_vm5 = vmor %vm242_vm4, %vm243_vm3 }
  0xcd   : > { %v239_v42 = vsub.f32 1.0, %v238_v6 }
  0xcf   : > { %v240_v55 = vmul.f32 %v1905_v46, %v239_v42 }
  0xd1   : > { %v241_v58 = vadd.f32 %v1905_v46, %v240_v55 }
  0xd3   : > { %v245_v7 = vsel %vm244_vm5, %v1905_v46, %v241_v58 }
  0xd4   : > { %v250_v30 = vsel %vm247_vm6, %v249_v1, %v245_v7  ;;  %v299_v1 = vld [vmem:[%s2182_s5 + $0x138] sm:$0xff] }
  0xd5   : > { %v256_v2 = vperm.slane %v250_v30, %v255_v57  ;;  %v298_v30 = vld [vmem:[%s2182_s5 + $0x130] sm:$0xff] }
  0xd7   : > { %v258_v35 = vmul.f32 %v256_v2, %v2188_v0  ;;  %v2778_v2 = vand.u32 4294901760, %v299_v1 }
  0xd9   : > { %326 = vst [vmem:[#allocation1] ss:$4 sm:$0xff] %v258_v35 }
  0xe0   : > { %v327_v41 = vld.sshfl [vmem:[#allocation1] sm:$0xff pattern:$0x73625140]  ;;  %v328_v48 = vld.sshfl [vmem:[#allocation1 + $0x8] sm:$0xff pattern:$0x73625140] }
  0xe1   : > { %v367_v16 = vand.u32 4294901760, %v327_v41  ;;  %v2638_v6 = vand.u32 4294901760, %v328_v48 }
  0xe3   : > { %473 = vmatmul.f32.vlgmr.msra.gmra.mxu1 %v367_v16  ;;  %v368_v42 = vsub.f32 %v327_v41, %v367_v16  ;;  %v2641_v60 = vsub.f32 %v328_v48, %v2638_v6  ;;  %v297_v41 = vld [vmem:[%s2182_s5 + $0x128] sm:$0xff] }
  0xe4   : > { %873 = vmatpush.msra.mxu1 %v2402_v29 }
  0xe5   : > { %527 = vmatmul.f32.vlgmr.msra.gmra.mxu2 %v368_v42  ;;  %v369_v33 = vand.u32 4294901760, %v368_v42  ;;  %v710_v46 = vand.u32 4294901760, %v2641_v60 }
  0xe6   : > { %875 = vmatpush.msra.mxu1 %v2411_v36  ;;  %914 = vmatpush.msra.mxu2 %v719_v10 }
  0xe7   : > { %566 = vmatmul.f32.vlgmr.msra.gmra.mxu3 %v369_v33  ;;  %v370_v0 = vsub.f32 %v368_v42, %v369_v33  ;;  %v711_v47 = vsub.f32 %v2641_v60, %v710_v46  ;;  %v296_v42 = vld [vmem:[%s2182_s5 + $0x120] sm:$0xff]  ;;  %v2808_v33 = vand.u32 4294901760, %v297_v41 }
  0xe8   : > { %877 = vmatpush.msra.mxu1 %v2421_v14  ;;  %918 = vmatpush.msra.mxu2 %v725_v15 }
  0xe9   : > { %981 = vmatpush.msra.mxu3 %v2402_v29  ;;  %v371_v22 = vand.u32 4294901760, %v370_v0  ;;  %v712_v10 = vand.u32 4294901760, %v711_v47  ;;  %v307_v29 = vld [vmem:[%s2182_s5 + $0x178] sm:$0xff] }
  0xea   : > { %879 = vmatpush.msra.mxu1 %v2434_v63  ;;  %922 = vmatpush.msra.mxu2 %v731_v24  ;;  %v295_v0 = vld [vmem:[%s2182_s5 + $0x118] sm:$0xff] }
  0xeb   : > { %983 = vmatpush.msra.mxu3 %v2411_v36  ;;  %372 = vmatmul.f32.vlgmr.msra.gmra.mxu0 %v371_v22  ;;  %v306_v36 = vld [vmem:[%s2182_s5 + $0x170] sm:$0xff]  ;;  %v2821_v22 = vand.u32 4294901760, %v296_v42 }
  0xec   : > { %672 = vmatmul.f32.vlgmr.msrb.gmra.mxu1 %v367_v16  ;;  %820 = vmatpush.msra.mxu0 %v2414_v37  ;;  %v2678_v37 = vand.u32 4294901760, %v307_v29  ;;  %v2685_v15 = vand.u32 4294901760, %v306_v36 }
  0xed   : > { %881 = vmatpush.msra.mxu1 %v2448_v25  ;;  %926 = vmatpush.msra.mxu2 %v737_v32 }
  0xee   : > { %985 = vmatpush.msra.mxu3 %v2421_v14  ;;  %713 = vmatmul.f32.vlgmr.msrb.gmra.mxu2 %v712_v10  ;;  %v3346_v14 = vand.u32 4294901760, %v2495_v12  ;;  %v2694_v24 = vsub.f32 %v307_v29, %v2678_v37  ;;  %v294_v29 = vld [vmem:[%s2182_s5 + $0x110] sm:$0xff] }
  0xef   : > { %823 = vmatpush.msra.mxu0 %v2424_v52  ;;  %883 = vmatpush.msra.mxu1 %v2461_v31  ;;  %v305_v52 = vld [vmem:[%s2182_s5 + $0x168] sm:$0xff] }
  0xf0   : > { %930 = vmatpush.msra.mxu2 %v743_v39  ;;  %987 = vmatpush.msra.mxu3 %v2434_v63  ;;  %v304_v63 = vld [vmem:[%s2182_s5 + $0x160] sm:$0xff]  ;;  %v3349_v39 = vand.u32 4294901760, %v2531_v11 }
  0xf1   : > { %814 = vmatmul.f32.vlgmr.msrb.gmra.mxu3 %v2638_v6  ;;  %826 = vmatpush.msra.mxu0 %v2437_v18  ;;  %v3347_v18 = vand.u32 4294901760, %v2511_v38  ;;  %v2707_v32 = vand.u32 4294901760, %v304_v63 }
  0xf2   : > { %885 = vmatpush.msra.mxu1 %v2473_v51  ;;  %934 = vmatpush.msra.mxu2 %v749_v9 }
  0xf3   : > { %989 = vmatpush.msra.mxu3 %v2448_v25  ;;  %829 = vmatpush.msra.mxu0 %v2452_v4  ;;  %v2696_v25 = vand.u32 4294901760, %v305_v52  ;;  %v303_v4 = vld [vmem:[%s2182_s5 + $0x158] sm:$0xff]  ;;  %v2729_v55 = vsub.f32 %v304_v63, %v2707_v32 }
  0xf4   : > { %887 = vmatpush.msra.mxu1 %v2492_v19  ;;  %938 = vmatpush.msra.mxu2 %v3346_v14  ;;  %v2718_v9 = vand.u32 4294901760, %v303_v4  ;;  %v2834_v14 = vand.u32 4294901760, %v295_v0 }
  0xf5   : > { %991 = vmatpush.msra.mxu3 %v2461_v31  ;;  %635 = vmatmul.f32.vlgmr.msrb.gmra.mxu0 %v367_v16  ;;  %v3348_v31 = vand.u32 4294901760, %v2525_v8 }
  0xf6   : > { %832 = vmatpush.msra.mxu0 %v2464_v5  ;;  %889 = vmatpush.msra.mxu1 %v2508_v17  ;;  %v2705_v5 = vsub.f32 %v306_v36, %v2685_v15  ;;  %v2744_v58 = vsub.f32 %v303_v4, %v2718_v9  ;;  %v2832_v36 = vsub.f32 %v297_v41, %v2808_v33 }
  0xf7   : > { %942 = vmatpush.msra.mxu2 %v3347_v18  ;;  %993 = vmatpush.msra.mxu3 %v2473_v51  ;;  %v3330_v51 = vand.u32 4294901760, %v2694_v24  ;;  %v2845_v4 = vsub.f32 %v296_v42, %v2821_v22 }
  0xf8   : > { %835 = vmatpush.msra.mxu0 %v2476_v53  ;;  %891 = vmatpush.msra.mxu1 %v2519_v43  ;;  %v2716_v53 = vsub.f32 %v305_v52, %v2696_v25  ;;  %v3324_v7 = vand.u32 4294901760, %v2744_v58  ;;  %v293_v52 = vld [vmem:[%s2182_s5 + $0x108] sm:$0xff] }
  0xf9   : > { %946 = vmatpush.msra.mxu2 %v3348_v31  ;;  %995 = vmatpush.msra.mxu3 %v2492_v19  ;;  %v302_v19 = vld [vmem:[%s2182_s5 + $0x150] sm:$0xff]  ;;  %v2847_v31 = vand.u32 4294901760, %v294_v29 }
  0xfa   : > { %838 = vmatpush.msra.mxu0 %v2495_v12  ;;  %893 = vmatpush.msra.mxu1 %v2528_v44  ;;  %v301_v12 = vld [vmem:[%s2182_s5 + $0x148] sm:$0xff]  ;;  %v2733_v28 = vand.u32 4294901760, %v302_v19  ;;  %v1085_v48 = vsub.f32 %v2744_v58, %v3324_v7 }
  0xfb   : > { %950 = vmatpush.msra.mxu2 %v3349_v39  ;;  %997 = vmatpush.msra.mxu3 %v2508_v17  ;;  %v3328_v17 = vand.u32 4294901760, %v2705_v5  ;;  %v292_v39 = vld [vmem:[%s2182_s5 + $0x100] sm:$0xff] }
  0xfc   : > { %841 = vmatpush.msra.mxu0 %v2511_v38  ;;  %895 = vmatpush.msra.mxu1 %v2544_v3  ;;  %v300_v38 = vld [vmem:[%s2182_s5 + $0x140] sm:$0xff]  ;;  %v1086_v10 = vand.u32 4294901760, %v1085_v48 }
  0xfd   : > { %954 = vmatpush.msra.mxu2 %v779_v21  ;;  %999 = vmatpush.msra.mxu3 %v2519_v43  ;;  %v1061_v43 = vsub.f32 %v2694_v24, %v3330_v51  ;;  %v3327_v21 = vand.u32 4294901760, %v2716_v53  ;;  %v2757_v57 = vand.u32 4294901760, %v300_v38 }
  0xfe   : > { %844 = vmatpush.msra.mxu0 %v2525_v8  ;;  %897 = vmatpush.msra.mxu1 %v2561_v26  ;;  %v2746_v8 = vand.u32 4294901760, %v301_v12 }
  0xff   : > { %958 = vmatpush.msra.mxu2 %v785_v61  ;;  %1001 = vmatpush.msra.mxu3 %v2528_v44  ;;  %v1067_v44 = vsub.f32 %v2705_v5, %v3328_v17  ;;  %v3326_v61 = vand.u32 4294901760, %v2729_v55  ;;  %v2787_v35 = vsub.f32 %v300_v38, %v2757_v57  ;;  %v2858_v38 = vsub.f32 %v295_v0, %v2834_v14  ;;  %v313_v17 = vld [vmem:[%s2182_s5 + $0x1a8] sm:$0xff] }
 0x100   : > { %847 = vmatpush.msra.mxu0 %v2531_v11  ;;  %899 = vmatpush.msra.mxu1 %v2574_v13  ;;  %v2763_v11 = vsub.f32 %v302_v19, %v2733_v28 }
 0x101   : > { %962 = vmatpush.msra.mxu2 %v791_v34  ;;  %1003 = vmatpush.msra.mxu3 %v2544_v3  ;;  %v1062_v3 = vand.u32 4294901760, %v1061_v43  ;;  %v1073_v34 = vsub.f32 %v2716_v53, %v3327_v21  ;;  %v2860_v43 = vand.u32 4294901760, %v293_v52 }
 0x102   : > { %850 = vmatpush.msra.mxu0 %v2547_v20  ;;  %901 = vmatpush.msra.mxu1 %v2585_v50  ;;  %v2773_v20 = vsub.f32 %v301_v12, %v2746_v8  ;;  %v3317_v12 = vand.u32 4294901760, %v2832_v36 }
 0x103   : > { %966 = vmatpush.msra.mxu2 %v797_v49  ;;  %1005 = vmatpush.msra.mxu3 %v2561_v26  ;;  %v1068_v26 = vand.u32 4294901760, %v1067_v44  ;;  %v1079_v49 = vsub.f32 %v2729_v55, %v3326_v61  ;;  %v3316_v44 = vand.u32 4294901760, %v2845_v4 }
 0x104   : > { %853 = vmatpush.msra.mxu0 %v2568_v45  ;;  %903 = vmatpush.msra.mxu1 %v2607_v59  ;;  %v3323_v45 = vand.u32 4294901760, %v2763_v11  ;;  %v3322_v16 = vand.u32 4294901760, %v2773_v20 }
 0x105   : > { %970 = vmatpush.msra.mxu2 %v803_v62  ;;  %1007 = vmatpush.msra.mxu3 %v2574_v13  ;;  %v2794_v62 = vand.u32 4294901760, %v298_v30  ;;  %v1074_v13 = vand.u32 4294901760, %v1073_v34 }
 0x106   : > { %907 = vmatmul.f32.vlgmr.msra.gmra.mxu1 %v710_v46  ;;  %856 = vmatpush.msra.mxu0 %v2582_v27  ;;  %v2806_v27 = vsub.f32 %v299_v1, %v2778_v2  ;;  %v3321_v46 = vand.u32 4294901760, %v2787_v35  ;;  %v2870_v1 = vsub.f32 %v294_v29, %v2847_v31 }
 0x107   : > { %1063 = vmatpush.msrb.mxu1 %v1062_v3  ;;  %974 = vmatpush.msra.mxu2 %v809_v23  ;;  %v1080_v23 = vand.u32 4294901760, %v1079_v49  ;;  %v2819_v47 = vsub.f32 %v298_v30, %v2794_v62  ;;  %v2872_v3 = vand.u32 4294901760, %v292_v39  ;;  %v1121_v30 = vsub.f32 %v2832_v36, %v3317_v12 }
 0x108   : > { %1009 = vmatpush.msra.mxu3 %v2585_v50  ;;  %976 = vmatmul.f32.vlgmr.msra.gmra.mxu2 %v2638_v6  ;;  %v1091_v50 = vsub.f32 %v2763_v11, %v3323_v45  ;;  %v2882_v49 = vsub.f32 %v293_v52, %v2860_v43  ;;  %v3314_v48 = vand.u32 4294901760, %v2870_v1 }
 0x109   : > { %1069 = vmatpush.msrb.mxu1 %v1068_v26  ;;  %1161 = vmatpush.msrb.mxu2 %v2694_v24  ;;  %v3318_v18 = vand.u32 4294901760, %v2819_v47  ;;  %v3315_v26 = vand.u32 4294901760, %v2858_v38  ;;  %v2892_v42 = vsub.f32 %v292_v39, %v2872_v3  ;;  %v1122_v0 = vand.u32 4294901760, %v1121_v30 }
 0x10a   : > { %859 = vmatpush.msra.mxu0 %v2588_v40  ;;  %1011 = vmatpush.msra.mxu3 %v2607_v59  ;;  %v1097_v40 = vsub.f32 %v2773_v20, %v3322_v16  ;;  %v3320_v59 = vand.u32 4294901760, %v2806_v27  ;;  %v1092_v63 = vand.u32 4294901760, %v1091_v50 }
 0x10b   : > { %1013 = vmatmul.f32.vlgmr.msra.gmra.mxu3 %v2638_v6  ;;  %1075 = vmatpush.msrb.mxu1 %v1074_v13  ;;  %v1103_v6 = vsub.f32 %v2787_v35, %v3321_v46  ;;  %v1127_v13 = vsub.f32 %v2845_v4, %v3316_v44  ;;  %v1133_v50 = vsub.f32 %v2858_v38, %v3315_v26  ;;  %v3313_v52 = vand.u32 4294901760, %v2892_v42  ;;  %v317_v44 = vld [vmem:[%s2182_s5 + $0x1c8] sm:$0xff] }
 0x10c   : > { %1164 = vmatpush.msrb.mxu2 %v2705_v5  ;;  %1214 = vmatpush.msrb.mxu3 %v2678_v37  ;;  %v1109_v19 = vsub.f32 %v2806_v27, %v3320_v59  ;;  %v315_v59 = vld [vmem:[%s2182_s5 + $0x1b8] sm:$0xff] }
 0x10d   : > { %862 = vmatpush.msra.mxu0 %v2610_v54  ;;  %1081 = vmatpush.msrb.mxu1 %v1080_v23  ;;  %v1098_v54 = vand.u32 4294901760, %v1097_v40  ;;  %v323_v23 = vld [vmem:[%s2182_s5 + $0x1f8] sm:$0xff]  ;;  %v322_v40 = vld [vmem:[%s2182_s5 + $0x1f0] sm:$0xff]  ;;  %v1128_v29 = vand.u32 4294901760, %v1127_v13  ;;  %v1151_v30 = vsub.f32 %v2892_v42, %v3313_v52  ;;  %v320_v13 = vld [vmem:[%s2182_s5 + $0x1e0] sm:$0xff]  ;;  %v3005_v61 = vand.u32 4294901760, %v315_v59 }
 0x10e   : > { %1167 = vmatpush.msrb.mxu2 %v2716_v53  ;;  %1216 = vmatpush.msrb.mxu3 %v2685_v15  ;;  %v1110_v34 = vand.u32 4294901760, %v1109_v19  ;;  %v2918_v19 = vand.u32 4294901760, %v322_v40  ;;  %v318_v52 = vld [vmem:[%s2182_s5 + $0x1d0] sm:$0xff] }
 0x10f   : > { %865 = vmatpush.msra.mxu0 %v2624_v56  ;;  %1087 = vmatpush.msrb.mxu1 %v1086_v10  ;;  %v1104_v56 = vand.u32 4294901760, %v1103_v6  ;;  %v3312_v10 = vand.u32 4294901760, %v2882_v49  ;;  %v1139_v6 = vsub.f32 %v2870_v1, %v3314_v48 }
 0x110   : > { %868 = vmatmul.f32.vlgmr.msra.gmra.mxu0 %v2641_v60  ;;  %1170 = vmatpush.msrb.mxu2 %v2729_v55  ;;  %v1115_v60 = vsub.f32 %v2819_v47, %v3318_v18 }
 0x111   : > { %1018 = vmatpush.msrb.mxu0 %v2678_v37  ;;  %1218 = vmatpush.msrb.mxu3 %v2696_v25  ;;  %v1145_v39 = vsub.f32 %v2882_v49, %v3312_v10  ;;  %v2940_v10 = vsub.f32 %v322_v40, %v2918_v19 }
 0x112   : > { %1093 = vmatpush.msrb.mxu1 %v1092_v63  ;;  %1173 = vmatpush.msrb.mxu2 %v2744_v58  ;;  %v1116_v41 = vand.u32 4294901760, %v1115_v60  ;;  %v2910_v63 = vand.u32 4294901760, %v323_v23  ;;  %v329_v60 = vld.sshfl [vmem:[#allocation1 + $0x10] sm:$0xff pattern:$0x73625140] }
 0x113   : > { %1020 = vmatpush.msrb.mxu0 %v2685_v15  ;;  %1220 = vmatpush.msrb.mxu3 %v2707_v32  ;;  %v3325_v26 = vand.u32 4294901760, %v2940_v10 }
 0x114   : > { %1099 = vmatpush.msrb.mxu1 %v1098_v54  ;;  %1176 = vmatpush.msrb.mxu2 %v2763_v11  ;;  %v1134_v54 = vand.u32 4294901760, %v1133_v50  ;;  %v319_v50 = vld [vmem:[%s2182_s5 + $0x1d8] sm:$0xff] }
 0x115   : > { %1022 = vmatpush.msrb.mxu0 %v2696_v25  ;;  %1222 = vmatpush.msrb.mxu3 %v2718_v9 }
 0x116   : > { %1105 = vmatpush.msrb.mxu1 %v1104_v56  ;;  %1179 = vmatpush.msrb.mxu2 %v2773_v20  ;;  %v321_v56 = vld [vmem:[%s2182_s5 + $0x1e8] sm:$0xff] }
 0x117   : > { %1024 = vmatpush.msrb.mxu0 %v2707_v32  ;;  %1224 = vmatpush.msrb.mxu3 %v2733_v28 }
 0x118   : > { %1111 = vmatpush.msrb.mxu1 %v1110_v34  ;;  %1182 = vmatpush.msrb.mxu2 %v2787_v35  ;;  %v1140_v34 = vand.u32 4294901760, %v1139_v6  ;;  %v2937_v6 = vand.u32 4294901760, %v329_v60 }
 0x119   : > { %1026 = vmatpush.msrb.mxu0 %v2718_v9  ;;  %1226 = vmatpush.msrb.mxu3 %v2746_v8 }
 0x11a   : > { %1117 = vmatpush.msrb.mxu1 %v1116_v41  ;;  %1185 = vmatpush.msrb.mxu2 %v2806_v27  ;;  %v2928_v41 = vsub.f32 %v323_v23, %v2910_v63  ;;  %v2944_v23 = vand.u32 4294901760, %v320_v13 }
 0x11b   : > { %1028 = vmatpush.msrb.mxu0 %v2733_v28  ;;  %1228 = vmatpush.msrb.mxu3 %v2757_v57 }
 0x11c   : > { %1123 = vmatpush.msrb.mxu1 %v1122_v0  ;;  %1188 = vmatpush.msrb.mxu2 %v2819_v47  ;;  %v2933_v0 = vand.u32 4294901760, %v321_v56  ;;  %v3319_v48 = vand.u32 4294901760, %v2928_v41  ;;  %v2965_v12 = vsub.f32 %v320_v13, %v2944_v23  ;;  %v2978_v13 = vand.u32 4294901760, %v317_v44 }
 0x11d   : > { %1030 = vmatpush.msrb.mxu0 %v2746_v8  ;;  %1230 = vmatpush.msrb.mxu3 %v2778_v2 }
 0x11e   : > { %1129 = vmatpush.msrb.mxu1 %v1128_v29  ;;  %1191 = vmatpush.msrb.mxu2 %v2832_v36  ;;  %v1146_v29 = vand.u32 4294901760, %v1145_v39  ;;  %v2949_v39 = vand.u32 4294901760, %v319_v50  ;;  %v2954_v40 = vsub.f32 %v321_v56, %v2933_v0  ;;  %v1402_v56 = vsub.f32 %v2928_v41, %v3319_v48 }
 0x11f   : > { %1032 = vmatpush.msrb.mxu0 %v2757_v57  ;;  %1232 = vmatpush.msrb.mxu3 %v2794_v62  ;;  %v3331_v46 = vand.u32 4294901760, %v2965_v12 }
 0x120   : > { %1135 = vmatpush.msrb.mxu1 %v1134_v54  ;;  %1194 = vmatpush.msrb.mxu2 %v2845_v4  ;;  %v1152_v54 = vand.u32 4294901760, %v1151_v30  ;;  %v2959_v30 = vand.u32 4294901760, %v318_v52  ;;  %v3329_v18 = vand.u32 4294901760, %v2954_v40  ;;  %v1403_v45 = vand.u32 4294901760, %v1402_v56 }
 0x121   : > { %1034 = vmatpush.msrb.mxu0 %v2778_v2  ;;  %1234 = vmatpush.msrb.mxu3 %v2808_v33 }
 0x122   : > { %1141 = vmatpush.msrb.mxu1 %v1140_v34  ;;  %1197 = vmatpush.msrb.mxu2 %v2858_v38  ;;  %v1050_v34 = vsub.f32 %v329_v60, %v2937_v6  ;;  %v2972_v60 = vsub.f32 %v319_v50, %v2949_v39  ;;  %v1408_v50 = vsub.f32 %v2940_v10, %v3325_v26  ;;  %v314_v26 = vld [vmem:[%s2182_s5 + $0x1b0] sm:$0xff] }
 0x123   : > { %1036 = vmatpush.msrb.mxu0 %v2794_v62  ;;  %1236 = vmatpush.msrb.mxu3 %v2821_v22  ;;  %v2986_v48 = vsub.f32 %v318_v52, %v2959_v30  ;;  %v3003_v52 = vsub.f32 %v317_v44, %v2978_v13  ;;  %v1420_v44 = vsub.f32 %v2965_v12, %v3331_v46  ;;  %v3018_v51 = vand.u32 4294901760, %v314_v26 }
 0x124   : > { %1147 = vmatpush.msrb.mxu1 %v1146_v29  ;;  %1200 = vmatpush.msrb.mxu2 %v2870_v1  ;;  %3350 = vst [vmem:[#allocation12_spill] sm:$0xff] %v2972_v60  ;;  %v316_v29 = vld [vmem:[%s2182_s5 + $0x1c0] sm:$0xff]  ;;  %v3332_v7 = vand.u32 4294901760, %v2972_v60  ;;  %v1409_v56 = vand.u32 4294901760, %v1408_v50  ;;  %v3031_v46 = vand.u32 4294901760, %v313_v17 }
 0x125   : > { %1038 = vmatpush.msrb.mxu0 %v2808_v33  ;;  %1238 = vmatpush.msrb.mxu3 %v2834_v14  ;;  %3351 = vst [vmem:[#allocation13_spill] sm:$0xff] %v2986_v48  ;;  %v2992_v16 = vand.u32 4294901760, %v316_v29 }
 0x126   : > { %1153 = vmatpush.msrb.mxu1 %v1152_v54  ;;  %1203 = vmatpush.msrb.mxu2 %v2882_v49  ;;  %v1051_v54 = vand.u32 4294901760, %v1050_v34 }
 0x127   : > { %1040 = vmatpush.msrb.mxu0 %v2821_v22  ;;  %1240 = vmatpush.msrb.mxu3 %v2847_v31 }
 0x128   : > { %1155 = vmatmul.f32.vlgmr.msrb.gmra.mxu1 %v2937_v6  ;;  %1206 = vmatpush.msrb.mxu2 %v2892_v42  ;;  %v1052_v21 = vsub.f32 %v1050_v34, %v1051_v54 }
 0x129   : > { %1322 = vmatpush.msra.mxu1 %v2678_v37  ;;  %1042 = vmatpush.msrb.mxu0 %v2834_v14  ;;  %v1414_v37 = vsub.f32 %v2954_v40, %v3329_v18  ;;  %v3016_v18 = vsub.f32 %v316_v29, %v2992_v16  ;;  %v3029_v29 = vsub.f32 %v315_v59, %v3005_v61 }
 0x12a   : > { %1242 = vmatpush.msrb.mxu3 %v2860_v43  ;;  %1209 = vmatmul.f32.vlgmr.msrb.gmra.mxu2 %v1050_v34  ;;  %v1426_v34 = vsub.f32 %v2972_v60, %v3332_v7  ;;  %v311_v60 = vld [vmem:[%s2182_s5 + $0x198] sm:$0xff] }
 0x12b   : > { %1324 = vmatpush.msra.mxu1 %v2685_v15  ;;  %1359 = vmatpush.msra.mxu2 %v2910_v63  ;;  %v3335_v15 = vand.u32 4294901760, %v2986_v48  ;;  %v3338_v59 = vand.u32 4294901760, %v3029_v29 }
 0x12c   : > { %1044 = vmatpush.msrb.mxu0 %v2847_v31  ;;  %1244 = vmatpush.msrb.mxu3 %v2872_v3 }
 0x12d   : > { %1248 = vmatmul.f32.vlgmr.msrb.gmra.mxu3 %v1051_v54  ;;  %1326 = vmatpush.msra.mxu1 %v2696_v25  ;;  %v312_v54 = vld [vmem:[%s2182_s5 + $0x1a0] sm:$0xff]  ;;  %v1415_v25 = vand.u32 4294901760, %v1414_v37  ;;  %v1432_v7 = vsub.f32 %v2986_v48, %v3335_v15  ;;  %v3042_v37 = vsub.f32 %v314_v26, %v3018_v51  ;;  %v3352_v15 = vand.u32 4294901760, %v2694_v24 }
 0x12e   : > { %1361 = vmatpush.msra.mxu2 %v2918_v19  ;;  %1404 = vmatpush.msra.mxu3 %v1403_v45  ;;  %v1053_v45 = vand.u32 4294901760, %v1052_v21  ;;  %v3044_v50 = vand.u32 4294901760, %v312_v54  ;;  %v1427_v21 = vand.u32 4294901760, %v1426_v34  ;;  %v3055_v26 = vsub.f32 %v313_v17, %v3031_v46 }
 0x12f   : > { %1046 = vmatpush.msrb.mxu0 %v2860_v43  ;;  %1328 = vmatpush.msra.mxu1 %v2707_v32  ;;  %v1421_v32 = vand.u32 4294901760, %v1420_v44  ;;  %v3057_v48 = vand.u32 4294901760, %v311_v60  ;;  %v1433_v34 = vand.u32 4294901760, %v1432_v7  ;;  %v3354_v24 = vand.u32 4294901760, %v2705_v5 }
 0x130   : > { %1363 = vmatpush.msra.mxu2 %v2933_v0  ;;  %1410 = vmatpush.msra.mxu3 %v1409_v56  ;;  %v310_v56 = vld [vmem:[%s2182_s5 + $0x190] sm:$0xff]  ;;  %v3068_v17 = vsub.f32 %v312_v54, %v3044_v50  ;;  %v3356_v5 = vand.u32 4294901760, %v2716_v53  ;;  %v3357_v53 = vand.u32 4294901760, %v2729_v55  ;;  %v3359_v55 = vand.u32 4294901760, %v2744_v58 }
 0x131   : > { %1048 = vmatpush.msrb.mxu0 %v2872_v3  ;;  %1330 = vmatpush.msra.mxu1 %v2718_v9  ;;  %v3353_v9 = vand.u32 4294901760, %v3003_v52  ;;  %v3082_v54 = vsub.f32 %v311_v60, %v3057_v48 }
 0x132   : > { %1054 = vmatmul.f32.vlgmr.msrb.gmra.mxu0 %v1053_v45  ;;  %1365 = vmatpush.msra.mxu2 %v2944_v23  ;;  %v330_v45 = vld.sshfl [vmem:[#allocation1 + $0x18] sm:$0xff pattern:$0x73625140]  ;;  %v1467_v60 = vand.u32 4294901760, %v3068_v17 }
 0x133   : > { %1255 = vmatpush.msra.mxu0 %v3352_v15  ;;  %1416 = vmatpush.msra.mxu3 %v1415_v25  ;;  %v1438_v44 = vsub.f32 %v3003_v52, %v3353_v9  ;;  %v3355_v15 = vand.u32 4294901760, %v3016_v18  ;;  %v3070_v9 = vand.u32 4294901760, %v310_v56 }
 0x134   : > { %1332 = vmatpush.msra.mxu1 %v2733_v28  ;;  %1367 = vmatpush.msra.mxu2 %v2949_v39  ;;  %v309_v28 = vld [vmem:[%s2182_s5 + $0x188] sm:$0xff] }
 0x135   : > { %1259 = vmatpush.msra.mxu0 %v3354_v24  ;;  %1422 = vmatpush.msra.mxu3 %v1421_v32  ;;  %v1444_v25 = vsub.f32 %v3016_v18, %v3355_v15  ;;  %v1439_v7 = vand.u32 4294901760, %v1438_v44  ;;  %v1450_v32 = vsub.f32 %v3029_v29, %v3338_v59  ;;  %v308_v15 = vld [vmem:[%s2182_s5 + $0x180] sm:$0xff]  ;;  %v3358_v44 = vand.u32 4294901760, %v3042_v37 }
 0x136   : > { %1334 = vmatpush.msra.mxu1 %v2746_v8  ;;  %1369 = vmatpush.msra.mxu2 %v2959_v30  ;;  %v3087_v8 = vand.u32 4294901760, %v309_v28  ;;  %v3096_v59 = vsub.f32 %v310_v56, %v3070_v9  ;;  %v3102_v24 = vand.u32 4294901760, %v330_v45  ;;  %v1473_v56 = vand.u32 4294901760, %v3082_v54 }
 0x137   : > { %1263 = vmatpush.msra.mxu0 %v3356_v5  ;;  %1428 = vmatpush.msra.mxu3 %v1427_v21  ;;  %v1445_v21 = vand.u32 4294901760, %v1444_v25  ;;  %v1456_v5 = vsub.f32 %v3042_v37, %v3358_v44  ;;  %v3360_v25 = vand.u32 4294901760, %v3055_v26  ;;  %v3361_v44 = vand.u32 4294901760, %v2763_v11 }
 0x138   : > { %1336 = vmatpush.msra.mxu1 %v2757_v57  ;;  %1371 = vmatpush.msra.mxu2 %v2978_v13  ;;  %v3100_v57 = vand.u32 4294901760, %v308_v15  ;;  %v3362_v11 = vand.u32 4294901760, %v2773_v20 }
 0x139   : > { %1267 = vmatpush.msra.mxu0 %v3357_v53  ;;  %1434 = vmatpush.msra.mxu3 %v1433_v34  ;;  %v1451_v34 = vand.u32 4294901760, %v1450_v32  ;;  %v1462_v53 = vsub.f32 %v3055_v26, %v3360_v25  ;;  %v1457_v58 = vand.u32 4294901760, %v1456_v5  ;;  %v1479_v32 = vand.u32 4294901760, %v3096_v59 }
 0x13a   : > { %1338 = vmatpush.msra.mxu1 %v2778_v2  ;;  %1373 = vmatpush.msra.mxu2 %v2992_v16  ;;  %v3113_v2 = vsub.f32 %v309_v28, %v3087_v8  ;;  %v3127_v28 = vsub.f32 %v308_v15, %v3100_v57  ;;  %v1474_v5 = vsub.f32 %v3082_v54, %v1473_v56 }
 0x13b   : > { %1271 = vmatpush.msra.mxu0 %v3359_v55  ;;  %1440 = vmatpush.msra.mxu3 %v1439_v7  ;;  %v1468_v7 = vsub.f32 %v3068_v17, %v1467_v60  ;;  %v1480_v20 = vsub.f32 %v3096_v59, %v1479_v32 }
 0x13c   : > { %1340 = vmatpush.msra.mxu1 %v2794_v62  ;;  %1375 = vmatpush.msra.mxu2 %v3005_v61  ;;  %v3124_v62 = vsub.f32 %v330_v45, %v3102_v24  ;;  %v3363_v45 = vand.u32 4294901760, %v2787_v35  ;;  %v1475_v35 = vand.u32 4294901760, %v1474_v5  ;;  %v3375_v5 = vand.u32 4294901760, %v2965_v12 }
 0x13d   : > { %1275 = vmatpush.msra.mxu0 %v3361_v44  ;;  %1446 = vmatpush.msra.mxu3 %v1445_v21  ;;  %v1463_v21 = vand.u32 4294901760, %v1462_v53  ;;  %v1469_v15 = vand.u32 4294901760, %v1468_v7  ;;  %v1481_v53 = vand.u32 4294901760, %v1480_v20  ;;  %v3366_v44 = vand.u32 4294901760, %v2832_v36 }
 0x13e   : > { %1342 = vmatpush.msra.mxu1 %v2808_v33  ;;  %1377 = vmatpush.msra.mxu2 %v3018_v51  ;;  %v1485_v33 = vand.u32 4294901760, %v3113_v2  ;;  %v1392_v55 = vand.u32 4294901760, %v3124_v62  ;;  %v3368_v36 = vand.u32 4294901760, %v2858_v38  ;;  %v3372_v38 = vand.u32 4294901760, %v2882_v49  ;;  %v3376_v49 = vld [vmem:[#allocation12_spill] sm:$0xff] }
 0x13f   : > { %1279 = vmatpush.msra.mxu0 %v3362_v11  ;;  %1452 = vmatpush.msra.mxu3 %v1451_v34  ;;  %v3364_v34 = vand.u32 4294901760, %v2806_v27  ;;  %v3371_v11 = vand.u32 4294901760, %v2940_v10 }
 0x140   : > { %1344 = vmatpush.msra.mxu1 %v2821_v22  ;;  %1379 = vmatpush.msra.mxu2 %v3031_v46  ;;  %v1491_v22 = vand.u32 4294901760, %v3127_v28  ;;  %v1486_v25 = vsub.f32 %v3113_v2, %v1485_v33  ;;  %v1393_v27 = vsub.f32 %v3124_v62, %v1392_v55 }
 0x141   : > { %1283 = vmatpush.msra.mxu0 %v3363_v45  ;;  %1458 = vmatpush.msra.mxu3 %v1457_v58 }
 0x142   : > { %1346 = vmatpush.msra.mxu1 %v2834_v14  ;;  %1381 = vmatpush.msra.mxu2 %v3044_v50  ;;  %v3365_v14 = vand.u32 4294901760, %v2819_v47  ;;  %v1487_v47 = vand.u32 4294901760, %v1486_v25  ;;  %v1394_v58 = vand.u32 4294901760, %v1393_v27 }
 0x143   : > { %1287 = vmatpush.msra.mxu0 %v3364_v34  ;;  %1464 = vmatpush.msra.mxu3 %v1463_v21  ;;  %v3373_v21 = vand.u32 4294901760, %v2954_v40 }
 0x144   : > { %1348 = vmatpush.msra.mxu1 %v2847_v31  ;;  %1383 = vmatpush.msra.mxu2 %v3057_v48  ;;  %v1492_v31 = vsub.f32 %v3127_v28, %v1491_v22 }
 0x145   : > { %1291 = vmatpush.msra.mxu0 %v3365_v14  ;;  %1470 = vmatpush.msra.mxu3 %v1469_v15 }
 0x146   : > { %1350 = vmatpush.msra.mxu1 %v2860_v43  ;;  %1385 = vmatpush.msra.mxu2 %v3070_v9  ;;  %v3367_v43 = vand.u32 4294901760, %v2845_v4  ;;  %v1493_v7 = vand.u32 4294901760, %v1492_v31  ;;  %v3370_v4 = vand.u32 4294901760, %v2870_v1  ;;  %v3374_v1 = vand.u32 4294901760, %v2892_v42  ;;  %v3378_v42 = vld [vmem:[#allocation13_spill] sm:$0xff] }
 0x147   : > { %1295 = vmatpush.msra.mxu0 %v3366_v44  ;;  %1476 = vmatpush.msra.mxu3 %v1475_v35 }
 0x148   : > { %1352 = vmatpush.msra.mxu1 %v2872_v3  ;;  %1387 = vmatpush.msra.mxu2 %v3087_v8  ;;  %v3369_v3 = vand.u32 4294901760, %v2928_v41 }
 0x149   : > { %1299 = vmatpush.msra.mxu0 %v3367_v43  ;;  %1482 = vmatpush.msra.mxu3 %v1481_v53 }
 0x14a   : > { %1354 = vmatmul.f32.vlgmr.msra.gmra.mxu1 %v2937_v6  ;;  %1389 = vmatpush.msra.mxu2 %v3100_v57 }
 0x14b   : > { %1555 = vmatpush.msrb.mxu1 %v2910_v63  ;;  %1303 = vmatpush.msra.mxu0 %v3368_v36 }
 0x14c   : > { %1488 = vmatpush.msra.mxu3 %v1487_v47  ;;  %1395 = vmatmul.f32.vlgmr.msra.gmra.mxu2 %v1394_v58 }
 0x14d   : > { %1557 = vmatpush.msrb.mxu1 %v2918_v19  ;;  %1596 = vmatpush.msrb.mxu2 %v3369_v3 }
 0x14e   : > { %1307 = vmatpush.msra.mxu0 %v3370_v4  ;;  %1494 = vmatpush.msra.mxu3 %v1493_v7 }
 0x14f   : > { %1496 = vmatmul.f32.vlgmr.msra.gmra.mxu3 %v3102_v24  ;;  %1559 = vmatpush.msrb.mxu1 %v2933_v0 }
 0x150   : > { %1600 = vmatpush.msrb.mxu2 %v3371_v11  ;;  %1663 = vmatpush.msrb.mxu3 %v2910_v63  ;;  %v3377_v63 = vand.u32 4294901760, %v3376_v49 }
 0x151   : > { %1311 = vmatpush.msra.mxu0 %v3372_v38  ;;  %1561 = vmatpush.msrb.mxu1 %v2944_v23 }
 0x152   : > { %1604 = vmatpush.msrb.mxu2 %v3373_v21  ;;  %1665 = vmatpush.msrb.mxu3 %v2918_v19  ;;  %v3379_v19 = vand.u32 4294901760, %v3378_v42 }
 0x153   : > { %1315 = vmatpush.msra.mxu0 %v3374_v1  ;;  %1563 = vmatpush.msrb.mxu1 %v2949_v39 }
 0x154   : > { %1317 = vmatmul.f32.vlgmr.msra.gmra.mxu0 %v2937_v6  ;;  %1608 = vmatpush.msrb.mxu2 %v3375_v5  ;;  %v3384_v6 = vand.u32 4294901760, %v3055_v26 }
 0x155   : > { %1502 = vmatpush.msrb.mxu0 %v2928_v41  ;;  %1667 = vmatpush.msrb.mxu3 %v2933_v0  ;;  %v3380_v41 = vand.u32 4294901760, %v3003_v52  ;;  %v3382_v0 = vand.u32 4294901760, %v3029_v29 }
 0x156   : > { %1565 = vmatpush.msrb.mxu1 %v2959_v30  ;;  %1612 = vmatpush.msrb.mxu2 %v3377_v63 }
 0x157   : > { %1505 = vmatpush.msrb.mxu0 %v2940_v10  ;;  %1669 = vmatpush.msrb.mxu3 %v2944_v23  ;;  %v3381_v10 = vand.u32 4294901760, %v3016_v18 }
 0x158   : > { %1567 = vmatpush.msrb.mxu1 %v2978_v13  ;;  %1616 = vmatpush.msrb.mxu2 %v3379_v19 }
 0x159   : > { %1508 = vmatpush.msrb.mxu0 %v2954_v40  ;;  %1671 = vmatpush.msrb.mxu3 %v2949_v39 }
 0x15a   : > { %1569 = vmatpush.msrb.mxu1 %v2992_v16  ;;  %1620 = vmatpush.msrb.mxu2 %v3380_v41 }
 0x15b   : > { %1511 = vmatpush.msrb.mxu0 %v2965_v12  ;;  %1673 = vmatpush.msrb.mxu3 %v2959_v30  ;;  %v3383_v12 = vand.u32 4294901760, %v3042_v37 }
 0x15c   : > { %1571 = vmatpush.msrb.mxu1 %v3005_v61  ;;  %1624 = vmatpush.msrb.mxu2 %v3381_v10 }
 0x15d   : > { %1514 = vmatpush.msrb.mxu0 %v3376_v49  ;;  %1675 = vmatpush.msrb.mxu3 %v2978_v13 }
 0x15e   : > { %1573 = vmatpush.msrb.mxu1 %v3018_v51  ;;  %1628 = vmatpush.msrb.mxu2 %v3382_v0 }
 0x15f   : > { %1517 = vmatpush.msrb.mxu0 %v3378_v42  ;;  %1677 = vmatpush.msrb.mxu3 %v2992_v16 }
 0x160   : > { %1575 = vmatpush.msrb.mxu1 %v3031_v46  ;;  %1632 = vmatpush.msrb.mxu2 %v3383_v12 }
 0x161   : > { %1520 = vmatpush.msrb.mxu0 %v3003_v52  ;;  %1679 = vmatpush.msrb.mxu3 %v3005_v61  ;;  %v474_v61 = vpop.f32.mrf.mxu1 }
 0x162   : > { %1577 = vmatpush.msrb.mxu1 %v3044_v50  ;;  %1636 = vmatpush.msrb.mxu2 %v3384_v6 }
 0x163   : > { %1523 = vmatpush.msrb.mxu0 %v3016_v18  ;;  %1681 = vmatpush.msrb.mxu3 %v3018_v51 }
 0x164   : > { %1579 = vmatpush.msrb.mxu1 %v3057_v48  ;;  %1640 = vmatpush.msrb.mxu2 %v1467_v60 }
 0x165   : > { %1526 = vmatpush.msrb.mxu0 %v3029_v29  ;;  %1683 = vmatpush.msrb.mxu3 %v3031_v46 }
 0x166   : > { %1581 = vmatpush.msrb.mxu1 %v3070_v9  ;;  %1644 = vmatpush.msrb.mxu2 %v1473_v56 }
 0x167   : > { %1529 = vmatpush.msrb.mxu0 %v3042_v37  ;;  %1685 = vmatpush.msrb.mxu3 %v3044_v50 }
 0x168   : > { %1583 = vmatpush.msrb.mxu1 %v3087_v8  ;;  %1648 = vmatpush.msrb.mxu2 %v1479_v32  ;;  %v373_v51 = vpop.f32.mrf.mxu0  ;;  %v528_v46 = vpop.f32.mrf.mxu2 }
 0x169   : > { %1532 = vmatpush.msrb.mxu0 %v3055_v26  ;;  %1687 = vmatpush.msrb.mxu3 %v3057_v48  ;;  %v475_v16 = vadd.f32 %v474_v61, %v373_v51  ;;  %v673_v30 = vpop.f32.mrf.mxu1 }
 0x16a   : > { %1585 = vmatpush.msrb.mxu1 %v3100_v57  ;;  %1652 = vmatpush.msrb.mxu2 %v1485_v33  ;;  %v567_v48 = vpop.f32.mrf.mxu3 }
 0x16b   : > { %1535 = vmatpush.msrb.mxu0 %v3068_v17  ;;  %1689 = vmatpush.msrb.mxu3 %v3070_v9  ;;  %v529_v18 = vadd.f32 %v528_v46, %v475_v16 }
 0x16c   : > { %1589 = vmatmul.f32.vlgmr.msrb.gmra.mxu1 %v1392_v55  ;;  %1656 = vmatpush.msrb.mxu2 %v1491_v22 }
 0x16d   : > { %1538 = vmatpush.msrb.mxu0 %v3082_v54  ;;  %1691 = vmatpush.msrb.mxu3 %v3087_v8  ;;  %v568_v39 = vadd.f32 %v567_v48, %v529_v18 }
 0x16e   : > { %1658 = vmatmul.f32.vlgmr.msrb.gmra.mxu2 %v3102_v24 }
 0x16f   : > { %1541 = vmatpush.msrb.mxu0 %v3096_v59  ;;  %1693 = vmatpush.msrb.mxu3 %v3100_v57 }
 0x170   : > { %1695 = vmatmul.f32.vlgmr.msrb.gmra.mxu3 %v3102_v24 }
 0x171   : > { %1544 = vmatpush.msrb.mxu0 %v3113_v2  ;;  %v714_v52 = vpop.f32.mrf.mxu2 }
 0x172   : > { %v636_v23 = vpop.f32.mrf.mxu0 }
 0x173   : > { %1547 = vmatpush.msrb.mxu0 %v3127_v28  ;;  %v637_v40 = vadd.f32 %v636_v23, %v568_v39 }
 0x174   : > { %1550 = vmatmul.f32.vlgmr.msrb.gmra.mxu0 %v3124_v62  ;;  %v815_v29 = vpop.f32.mrf.mxu3 }
 0x175   : > { %v674_v13 = vadd.f32 %v673_v30, %v637_v40 }
 0x177   : > { %v715_v50 = vadd.f32 %v714_v52, %v674_v13 }
 0x179   : > { %v816_v37 = vadd.f32 %v815_v29, %v715_v50 }
 0x183   : > { %v908_v17 = vpop.f32.mrf.mxu1 }
 0x18b   : > { %v977_v24 = vpop.f32.mrf.mxu2 }
 0x18d   : > { %v869_v59 = vpop.f32.mrf.mxu0 }
 0x18e   : > { %v870_v26 = vadd.f32 %v869_v59, %v816_v37  ;;  %v1014_v8 = vpop.f32.mrf.mxu3 }
 0x190   : > { %v909_v9 = vadd.f32 %v908_v17, %v870_v26 }
 0x192   : > { %v978_v54 = vadd.f32 %v977_v24, %v909_v9 }
 0x194   : > { %v1015_v57 = vadd.f32 %v1014_v8, %v978_v54 }
 0x1a5   : > { %v1156_v2 = vpop.f32.mrf.mxu1 }
 0x1ad   : > { %v1210_v62 = vpop.f32.mrf.mxu2 }
 0x1af   : > { %v1055_v60 = vpop.f32.mrf.mxu0 }
 0x1b0   : > { %v1056_v56 = vadd.f32 %v1055_v60, %v1015_v57  ;;  %v1249_v33 = vpop.f32.mrf.mxu3 }
 0x1b2   : > { %v1157_v32 = vadd.f32 %v1156_v2, %v1056_v56 }
 0x1b4   : > { %v1211_v28 = vadd.f32 %v1210_v62, %v1157_v32 }
 0x1b6   : > { %v1250_v15 = vadd.f32 %v1249_v33, %v1211_v28 }
 0x1c7   : > { %v1355_v55 = vpop.f32.mrf.mxu1 }
 0x1cf   : > { %v1396_v34 = vpop.f32.mrf.mxu2 }
 0x1d1   : > { %v1318_v45 = vpop.f32.mrf.mxu0 }
 0x1d2   : > { %v1319_v20 = vadd.f32 %v1318_v45, %v1250_v15  ;;  %v1497_v25 = vpop.f32.mrf.mxu3 }
 0x1d4   : > { %v1356_v22 = vadd.f32 %v1355_v55, %v1319_v20 }
 0x1d6   : > { %v1397_v35 = vadd.f32 %v1396_v34, %v1356_v22 }
 0x1d8   : > { %v1498_v14 = vadd.f32 %v1497_v25, %v1397_v35 }
 0x1e9   : > { %v1590_v31 = vpop.f32.mrf.mxu1 }
 0x1f1   : > { %v1551_v53 = vpop.f32.mrf.mxu0  ;;  %v1659_v47 = vpop.f32.mrf.mxu2 }
 0x1f2   : > { %v1552_v27 = vadd.f32 %v1551_v53, %v1498_v14 }
 0x1f3   : > { %v1696_v58 = vpop.f32.mrf.mxu3 }
 0x1f4   : > { %v1591_v44 = vadd.f32 %v1590_v31, %v1552_v27 }
 0x1f6   : > { %v1660_v43 = vadd.f32 %v1659_v47, %v1591_v44 }
 0x1f8   : > { %v1697_v7 = vadd.f32 %v1696_v58, %v1660_v43 }
 0x1fa   : > { %1699 = vst [vmem:[%s195_s7] sm:$0x3] %v1697_v7 }
 0x1fb   : > { %1993 = shalt.err (!%p1990_p1)
}
 0x1fc   : > { %1832 = dma.vmem_to_hbm [thread:$0]  (%p2125_p8), %s1715_s8, 32, %s1717_s15, %s1701_s12  }
 0x1fd PF: > { %s1728_s17 = sand.u32 1, %s2032_s9   ;;  %p1843_p2 = pnand %p1813_p13, %p2129_p9 }
 0x1fe   : > { %s1729_s4 = scalar_lea.sflag [#allocation5], %s1728_s17 }
 0x1ff   : > { %p1844_p4 = pneg %p1843_p2 }
 0x201   : > { %2027 = dma.done.wait (%p1844_p4), %s1729_s4, 32  }
 0x202   : > { %2029 = vsyncadd (%p1844_p4), %s1729_s4, 4294967264  ;;  %s19_s14 = sadd.s32 1, %s2052_s14   ;;  %s3385_s9 = smov %s2036_s10 }
 0x203   : > { %p16_p6 = scmp.ge.s32.totalorder %s19_s14, 4   ;;  %s3386_s10 = smov %s2040_s11 }
 0x204   : > { %s3387_s11 = smov %s2167_s23  ;;  %s3388_s12 = smov %s2048_s13 }
 0x205   : > { %s3389_s13 = smov %s3391_s30  ;;  %18 = sbr.rel (!%p16_p6) target bundleno = 7 (0x7), region = 82 }
 0x20a   :  { %1735 = vsyncpa [#allocation4], 1 }
 0x20b   :  { %1737 = vsyncpa [#allocation4 + $0x1], 1 }
 0x20c   :  { %1738 = vsyncpa [#allocation7], 1 }
 0x20d   :  { %1740 = vsyncpa [#allocation7 + $0x1], 1 }
 0x20e   :  { %1741 = vsyncpa [#allocation5], 1 }
 0x20f   :  { %1743 = vsyncpa [#allocation5 + $0x1], 1 }

</bundles_post_ra>
